<compile_context>
chip_gen: v7x
topology: tpu7x:2x2x1
jax: 0.10.0
libtpu: 0.0.40
codegen_flags: <defaults>
</compile_context>

<pallas_src>
import functools

import numpy as np
import jax
import jax.numpy as jnp
from jax import lax
from jax.experimental import pallas as pl
from jax.experimental.pallas import tpu as pltpu


def _correlation_kernel(x1_ref, x2_ref, o_ref, p2_ref, *,
                        H, W, C, G, stride2, grid_radius, scale, D, D_pad):
    # x1_ref : (1, C, H*W)            input1, flattened spatial (lane-dense)
    # x2_ref : (1, C, H*W)            input2, flattened spatial
    # o_ref  : (1, D_pad, H*W)        D = (2*grid_radius+1)**2 displacement channels,
    #                                 padded to a multiple of 8 for dense sublane stores
    # p2_ref : (C, (H + 2*G) * W)     VMEM scratch: input2 with G zero/guard rows per side
    HW = H * W
    top = G * W                      # static; lane-aligned when 128 % W == 0 (G rounded)

    # ---- build the H-padded flat copy of input2 in VMEM -------------------
    # Only the two border strips + the interior are written (no full clear);
    # redone every grid step, so correct even when the "parallel" batch axis
    # is split across TensorCores (each core has its own scratch instance).
    zstrip = jnp.zeros((C, top), x2_ref.dtype)
    p2_ref[:, 0:top] = zstrip
    p2_ref[:, top + HW:top + HW + top] = zstrip
    p2_ref[:, top:top + HW] = x2_ref[0]

    # x1 loaded once; for small C it stays resident in vregs across all displacements.
    x1 = x1_ref[0].astype(jnp.float32)                        # (C, HW)

    # Column index of each flattened spatial position; fold the 1/(K*K*C) scale into the
    # x-shift validity mask so each displacement needs only one extra multiply.
    col = lax.broadcasted_iota(jnp.int32, (1, HW), 1) % W     # (1, HW)
    mask_scales = []
    for ix in range(-grid_radius, grid_radius + 1):
        dx = ix * stride2
        valid = jnp.logical_and(col + dx >= 0, col + dx < W)
        mask_scales.append(jnp.where(valid, jnp.float32(scale), jnp.float32(0.0)))

    # ---- unrolled displacement loop: lane-dense VPU multiply-accumulate ----
    # Rows are buffered and flushed as dense (8, HW) blocks (one vst stream per 8 rows).
    rows = []
    base = 0
    for iy in range(-grid_radius, grid_radius + 1):
        dy = iy * stride2
        row_start = (G + dy) * W                              # static
        for ix in range(-grid_radius, grid_radius + 1):
            dx = ix * stride2
            start = row_start + dx                            # static, >= 0
            win = p2_ref[:, pl.ds(start, HW)].astype(jnp.float32)   # (C, HW) window
            acc = jnp.sum(x1 * win, axis=0, keepdims=True)          # (1, HW)
            rows.append(acc * mask_scales[ix + grid_radius])
            if len(rows) == 8:
                blk = jnp.concatenate(rows, axis=0)                  # (8, HW)
                o_ref[0, pl.ds(base, 8), :] = blk.astype(o_ref.dtype)
                base += 8
                rows = []
    if rows:  # tail group: pad with zero rows up to the 8-row store
        rows = rows + [jnp.zeros((1, HW), jnp.float32)] * (D_pad - D)
        blk = jnp.concatenate(rows, axis=0)
        o_ref[0, pl.ds(base, 8), :] = blk.astype(o_ref.dtype)


def correlation_forward(input1, input2, *, pad_size, kernel_size, max_displacement,
                        stride1=1, stride2=2, corr_multiply=1):
    """input1/input2: (N, C, H, W) NCHW (PyTorch layout). Returns (N, D, H, W)."""
    N, C, H, W = input1.shape
    assert input2.shape == input1.shape
    k_radius = max(kernel_size - 1, 0) // 2
    k_eff = 2 * k_radius + 1
    # TODO(synk): general kernel_size>1 / stride1>1 / pad_size != max_displacement + k_radius
    #             and the subtractive correlation type are not implemented.
    assert k_eff == 1, "only kernel_size in {0, 1} is supported"
    assert stride1 == 1, "only stride1 == 1 is supported"
    assert pad_size == max_displacement + k_radius, "pad_size must equal the border"
    assert corr_multiply == 1, "only multiplicative correlation is supported"
    assert max_displacement <= W, "x-wrap guard rows require max_displacement <= W"

    grid_radius = max_displacement // stride2
    nd = 2 * grid_radius + 1
    D = nd * nd
    D_pad = ((D + 7) // 8) * 8           # pad so every output store is a dense 8-row block
    HW = H * W

    # Zero/guard rows per side of the in-kernel padded copy of input2:
    # max_displacement rows of true zero padding + >=1 guard row for x-wrap reads.
    G = max_displacement + 1
    if 128 % W == 0:  # round up so the interior copy starts lane-aligned (cheap win)
        per = 128 // W
        G = ((G + per - 1) // per) * per

    scale = 1.0 / float(k_eff * k_eff * C)

    # Keep the HBM dtype (no wrapper-side upcast materialization); widen in-kernel.
    x1f = input1.reshape(N, C, HW)
    x2f = input2.reshape(N, C, HW)
    out_dtype = input1.dtype

    kernel = functools.partial(
        _correlation_kernel, H=H, W=W, C=C, G=G,
        stride2=stride2, grid_radius=grid_radius, scale=scale, D=D, D_pad=D_pad)

    out_flat = pl.pallas_call(
        kernel,
        out_shape=jax.ShapeDtypeStruct((N, D_pad, HW), out_dtype),
        grid_spec=pltpu.PrefetchScalarGridSpec(
            num_scalar_prefetch=0,
            grid=(N,),
            in_specs=[
                pl.BlockSpec((1, C, HW), lambda n: (n, 0, 0)),
                pl.BlockSpec((1, C, HW), lambda n: (n, 0, 0)),
            ],
            out_specs=pl.BlockSpec((1, D_pad, HW), lambda n: (n, 0, 0)),
            scratch_shapes=[pltpu.VMEM((C, (H + 2 * G) * W), x2f.dtype)],
        ),
        compiler_params=pltpu.CompilerParams(
            dimension_semantics=("parallel",),
            vmem_limit_bytes=32 * 1024 * 1024),
    )(x1f, x2f)

    return out_flat[:, :D, :].reshape(N, D, H, W)


def correlation_reference(input1, input2, *, max_displacement, stride2):
    """Pure-JAX reference (kernel_size=1, stride1=1, pad_size=max_displacement)."""
    N, C, H, W = input1.shape
    r = max_displacement // stride2
    m = max_displacement
    x2p = jnp.pad(input2, ((0, 0), (0, 0), (m, m), (m, m)))
    rows = []
    for iy in range(-r, r + 1):
        for ix in range(-r, r + 1):
            dy, dx = iy * stride2, ix * stride2
            win = lax.dynamic_slice(x2p, (0, 0, m + dy, m + dx), (N, C, H, W))
            rows.append(jnp.mean(input1 * win, axis=1))
    return jnp.stack(rows, axis=1)


if __name__ == "__main__":
    # Small shapes consistent with the module's real (FlowNet-style) usage, scaled down:
    # N=2, C=4, 16x16 spatial; pad=max_disp=4, kernel_size=1, stride1=1, stride2=2
    # -> 25 displacement channels, output (2, 25, 16, 16).
    N, C, H, W = 2, 4, 16, 16
    pad_size, kernel_size, max_displacement, stride1, stride2, corr_multiply = 4, 1, 4, 1, 2, 1

    key = jax.random.PRNGKey(0)
    k1, k2 = jax.random.split(key)
    input1 = jax.random.normal(k1, (N, C, H, W), jnp.float32)
    input2 = jax.random.normal(k2, (N, C, H, W), jnp.float32)

    out = correlation_forward(
        input1, input2, pad_size=pad_size, kernel_size=kernel_size,
        max_displacement=max_displacement, stride1=stride1, stride2=stride2,
        corr_multiply=corr_multiply)
    out = jax.block_until_ready(out)

    ref = jax.block_until_ready(
        correlation_reference(input1, input2,
                              max_displacement=max_displacement, stride2=stride2))
    np.testing.assert_allclose(np.asarray(out), np.asarray(ref), rtol=1e-5, atol=1e-5)

    print("KERNEL_OK")
</pallas_src>

<mosaic_0001>
module attributes {stable_mosaic.version = 11 : i64} {
  func.func @_correlation_kernel(%arg0: i32, %arg1: memref<1x4x256xf32, #tpu.memory_space<vmem>>, %arg2: memref<1x4x256xf32, #tpu.memory_space<vmem>>, %arg3: memref<1x32x256xf32, #tpu.memory_space<vmem>>, %arg4: memref<4x512xf32, #tpu.memory_space<vmem>>) attributes {dimension_semantics = [#tpu.dimension_semantics<parallel>], iteration_bounds = array<i64: 2>, scalar_prefetch = 0 : i64, scratch_operands = 1 : i64, tpu.core_type = #tpu.core_type<tc>, window_params = [{transform_indices = @transform_0, window_bounds = array<i64: 1, 4, 256>}, {transform_indices = @transform_1, window_bounds = array<i64: 1, 4, 256>}, {transform_indices = @transform_2, window_bounds = array<i64: 1, 32, 256>}]} {
    %cst = arith.constant 0.000000e+00 : f32
    %0 = vector.broadcast %cst : f32 to vector<4x128xf32>
    %c0 = arith.constant 0 : index
    %c0_0 = arith.constant 0 : index
    %1 = vector.load %arg4[%c0, %c0_0] : memref<4x512xf32, #tpu.memory_space<vmem>>, vector<4x128xf32>
    tpu.vector_store %arg4[%c0, %c0_0], %0 {strides = array<i32>} : memref<4x512xf32, #tpu.memory_space<vmem>>, vector<4x128xf32>,
    %c0_1 = arith.constant 0 : index
    %c384 = arith.constant 384 : index
    %2 = vector.load %arg4[%c0_1, %c384] : memref<4x512xf32, #tpu.memory_space<vmem>>, vector<4x128xf32>
    tpu.vector_store %arg4[%c0_1, %c384], %0 {strides = array<i32>} : memref<4x512xf32, #tpu.memory_space<vmem>>, vector<4x128xf32>,
    %c0_2 = arith.constant 0 : index
    %c0_3 = arith.constant 0 : index
    %c0_4 = arith.constant 0 : index
    %3 = vector.load %arg2[%c0_2, %c0_3, %c0_4] : memref<1x4x256xf32, #tpu.memory_space<vmem>>, vector<1x4x256xf32>
    %4 = vector.shape_cast %3 : vector<1x4x256xf32> to vector<4x256xf32>
    %c0_5 = arith.constant 0 : index
    %c128 = arith.constant 128 : index
    %5 = vector.load %arg4[%c0_5, %c128] : memref<4x512xf32, #tpu.memory_space<vmem>>, vector<4x256xf32>
    tpu.vector_store %arg4[%c0_5, %c128], %4 {strides = array<i32>} : memref<4x512xf32, #tpu.memory_space<vmem>>, vector<4x256xf32>,
    %c0_6 = arith.constant 0 : index
    %c0_7 = arith.constant 0 : index
    %c0_8 = arith.constant 0 : index
    %6 = vector.load %arg1[%c0_6, %c0_7, %c0_8] : memref<1x4x256xf32, #tpu.memory_space<vmem>>, vector<1x4x256xf32>
    %7 = vector.shape_cast %6 : vector<1x4x256xf32> to vector<4x256xf32>
    %8 = tpu.iota {dimensions = array<i32: 1>} : vector<1x256xi32>
    %c16_i32 = arith.constant 16 : i32
    %c0_i32 = arith.constant 0 : i32
    %9 = arith.cmpi eq, %c16_i32, %c0_i32 : i32
    %c1_i32 = arith.constant 1 : i32
    %10 = arith.select %9, %c1_i32, %c16_i32 : i32
    %11 = vector.broadcast %10 : i32 to vector<1x256xi32>
    %12 = arith.remsi %8, %11 : vector<1x256xi32>
    %c0_i32_9 = arith.constant 0 : i32
    %13 = vector.broadcast %c0_i32_9 : i32 to vector<1x256xi32>
    %14 = arith.cmpi ne, %12, %13 : vector<1x256xi32>
    %c0_i32_10 = arith.constant 0 : i32
    %15 = vector.broadcast %c0_i32_10 : i32 to vector<1x256xi32>
    %16 = arith.cmpi slt, %12, %15 : vector<1x256xi32>
    %c0_i32_11 = arith.constant 0 : i32
    %17 = arith.cmpi slt, %10, %c0_i32_11 : i32
    %18 = vector.broadcast %17 : i1 to vector<1x256xi1>
    %19 = vector.broadcast %18 : vector<1x256xi1> to vector<1x256xi1>
    %20 = arith.xori %16, %19 : vector<1x256xi1>
    %21 = arith.andi %20, %14 : vector<1x256xi1>
    %22 = vector.broadcast %10 : i32 to vector<1x256xi32>
    %23 = arith.addi %12, %22 : vector<1x256xi32>
    %24 = arith.select %21, %23, %12 : vector<1x256xi1>, vector<1x256xi32>
    %c-4_i32 = arith.constant -4 : i32
    %25 = vector.broadcast %c-4_i32 : i32 to vector<1x256xi32>
    %26 = arith.addi %24, %25 : vector<1x256xi32>
    %c0_i32_12 = arith.constant 0 : i32
    %27 = vector.broadcast %c0_i32_12 : i32 to vector<1x256xi32>
    %28 = arith.cmpi sge, %26, %27 : vector<1x256xi32>
    %c-4_i32_13 = arith.constant -4 : i32
    %29 = vector.broadcast %c-4_i32_13 : i32 to vector<1x256xi32>
    %30 = arith.addi %24, %29 : vector<1x256xi32>
    %c16_i32_14 = arith.constant 16 : i32
    %31 = vector.broadcast %c16_i32_14 : i32 to vector<1x256xi32>
    %32 = arith.cmpi slt, %30, %31 : vector<1x256xi32>
    %33 = arith.andi %28, %32 : vector<1x256xi1>
    %cst_15 = arith.constant 2.500000e-01 : f32
    %cst_16 = arith.constant 0.000000e+00 : f32
    %34 = vector.broadcast %cst_15 : f32 to vector<1x256xf32>
    %35 = vector.broadcast %cst_16 : f32 to vector<1x256xf32>
    %36 = arith.select %33, %34, %35 : vector<1x256xi1>, vector<1x256xf32>
    %c-2_i32 = arith.constant -2 : i32
    %37 = vector.broadcast %c-2_i32 : i32 to vector<1x256xi32>
    %38 = arith.addi %24, %37 : vector<1x256xi32>
    %c0_i32_17 = arith.constant 0 : i32
    %39 = vector.broadcast %c0_i32_17 : i32 to vector<1x256xi32>
    %40 = arith.cmpi sge, %38, %39 : vector<1x256xi32>
    %c-2_i32_18 = arith.constant -2 : i32
    %41 = vector.broadcast %c-2_i32_18 : i32 to vector<1x256xi32>
    %42 = arith.addi %24, %41 : vector<1x256xi32>
    %c16_i32_19 = arith.constant 16 : i32
    %43 = vector.broadcast %c16_i32_19 : i32 to vector<1x256xi32>
    %44 = arith.cmpi slt, %42, %43 : vector<1x256xi32>
    %45 = arith.andi %40, %44 : vector<1x256xi1>
    %cst_20 = arith.constant 2.500000e-01 : f32
    %cst_21 = arith.constant 0.000000e+00 : f32
    %46 = vector.broadcast %cst_20 : f32 to vector<1x256xf32>
    %47 = vector.broadcast %cst_21 : f32 to vector<1x256xf32>
    %48 = arith.select %45, %46, %47 : vector<1x256xi1>, vector<1x256xf32>
    %c0_i32_22 = arith.constant 0 : i32
    %49 = vector.broadcast %c0_i32_22 : i32 to vector<1x256xi32>
    %50 = arith.addi %24, %49 : vector<1x256xi32>
    %c0_i32_23 = arith.constant 0 : i32
    %51 = vector.broadcast %c0_i32_23 : i32 to vector<1x256xi32>
    %52 = arith.cmpi sge, %50, %51 : vector<1x256xi32>
    %c0_i32_24 = arith.constant 0 : i32
    %53 = vector.broadcast %c0_i32_24 : i32 to vector<1x256xi32>
    %54 = arith.addi %24, %53 : vector<1x256xi32>
    %c16_i32_25 = arith.constant 16 : i32
    %55 = vector.broadcast %c16_i32_25 : i32 to vector<1x256xi32>
    %56 = arith.cmpi slt, %54, %55 : vector<1x256xi32>
    %57 = arith.andi %52, %56 : vector<1x256xi1>
    %cst_26 = arith.constant 2.500000e-01 : f32
    %cst_27 = arith.constant 0.000000e+00 : f32
    %58 = vector.broadcast %cst_26 : f32 to vector<1x256xf32>
    %59 = vector.broadcast %cst_27 : f32 to vector<1x256xf32>
    %60 = arith.select %57, %58, %59 : vector<1x256xi1>, vector<1x256xf32>
    %c2_i32 = arith.constant 2 : i32
    %61 = vector.broadcast %c2_i32 : i32 to vector<1x256xi32>
    %62 = arith.addi %24, %61 : vector<1x256xi32>
    %c0_i32_28 = arith.constant 0 : i32
    %63 = vector.broadcast %c0_i32_28 : i32 to vector<1x256xi32>
    %64 = arith.cmpi sge, %62, %63 : vector<1x256xi32>
    %c2_i32_29 = arith.constant 2 : i32
    %65 = vector.broadcast %c2_i32_29 : i32 to vector<1x256xi32>
    %66 = arith.addi %24, %65 : vector<1x256xi32>
    %c16_i32_30 = arith.constant 16 : i32
    %67 = vector.broadcast %c16_i32_30 : i32 to vector<1x256xi32>
    %68 = arith.cmpi slt, %66, %67 : vector<1x256xi32>
    %69 = arith.andi %64, %68 : vector<1x256xi1>
    %cst_31 = arith.constant 2.500000e-01 : f32
    %cst_32 = arith.constant 0.000000e+00 : f32
    %70 = vector.broadcast %cst_31 : f32 to vector<1x256xf32>
    %71 = vector.broadcast %cst_32 : f32 to vector<1x256xf32>
    %72 = arith.select %69, %70, %71 : vector<1x256xi1>, vector<1x256xf32>
    %c4_i32 = arith.constant 4 : i32
    %73 = vector.broadcast %c4_i32 : i32 to vector<1x256xi32>
    %74 = arith.addi %24, %73 : vector<1x256xi32>
    %c0_i32_33 = arith.constant 0 : i32
    %75 = vector.broadcast %c0_i32_33 : i32 to vector<1x256xi32>
    %76 = arith.cmpi sge, %74, %75 : vector<1x256xi32>
    %c4_i32_34 = arith.constant 4 : i32
    %77 = vector.broadcast %c4_i32_34 : i32 to vector<1x256xi32>
    %78 = arith.addi %24, %77 : vector<1x256xi32>
    %c16_i32_35 = arith.constant 16 : i32
    %79 = vector.broadcast %c16_i32_35 : i32 to vector<1x256xi32>
    %80 = arith.cmpi slt, %78, %79 : vector<1x256xi32>
    %81 = arith.andi %76, %80 : vector<1x256xi1>
    %cst_36 = arith.constant 2.500000e-01 : f32
    %cst_37 = arith.constant 0.000000e+00 : f32
    %82 = vector.broadcast %cst_36 : f32 to vector<1x256xf32>
    %83 = vector.broadcast %cst_37 : f32 to vector<1x256xf32>
    %84 = arith.select %81, %82, %83 : vector<1x256xi1>, vector<1x256xf32>
    %c0_38 = arith.constant 0 : index
    %c60 = arith.constant 60 : index
    %85 = vector.load %arg4[%c0_38, %c60] : memref<4x512xf32, #tpu.memory_space<vmem>>, vector<4x256xf32>
    %86 = arith.mulf %7, %85 : vector<4x256xf32>
    %cst_39 = arith.constant dense<0.000000e+00> : vector<256xf32>
    %87 = vector.multi_reduction <add>, %86, %cst_39 [0] : vector<4x256xf32> to vector<256xf32>
    %88 = vector.shape_cast %87 : vector<256xf32> to vector<1x256xf32>
    %89 = arith.mulf %88, %36 : vector<1x256xf32>
    %c0_40 = arith.constant 0 : index
    %c62 = arith.constant 62 : index
    %90 = vector.load %arg4[%c0_40, %c62] : memref<4x512xf32, #tpu.memory_space<vmem>>, vector<4x256xf32>
    %91 = arith.mulf %7, %90 : vector<4x256xf32>
    %cst_41 = arith.constant dense<0.000000e+00> : vector<256xf32>
    %92 = vector.multi_reduction <add>, %91, %cst_41 [0] : vector<4x256xf32> to vector<256xf32>
    %93 = vector.shape_cast %92 : vector<256xf32> to vector<1x256xf32>
    %94 = arith.mulf %93, %48 : vector<1x256xf32>
    %c0_42 = arith.constant 0 : index
    %c64 = arith.constant 64 : index
    %95 = vector.load %arg4[%c0_42, %c64] : memref<4x512xf32, #tpu.memory_space<vmem>>, vector<4x256xf32>
    %96 = arith.mulf %7, %95 : vector<4x256xf32>
    %cst_43 = arith.constant dense<0.000000e+00> : vector<256xf32>
    %97 = vector.multi_reduction <add>, %96, %cst_43 [0] : vector<4x256xf32> to vector<256xf32>
    %98 = vector.shape_cast %97 : vector<256xf32> to vector<1x256xf32>
    %99 = arith.mulf %98, %60 : vector<1x256xf32>
    %c0_44 = arith.constant 0 : index
    %c66 = arith.constant 66 : index
    %100 = vector.load %arg4[%c0_44, %c66] : memref<4x512xf32, #tpu.memory_space<vmem>>, vector<4x256xf32>
    %101 = arith.mulf %7, %100 : vector<4x256xf32>
    %cst_45 = arith.constant dense<0.000000e+00> : vector<256xf32>
    %102 = vector.multi_reduction <add>, %101, %cst_45 [0] : vector<4x256xf32> to vector<256xf32>
    %103 = vector.shape_cast %102 : vector<256xf32> to vector<1x256xf32>
    %104 = arith.mulf %103, %72 : vector<1x256xf32>
    %c0_46 = arith.constant 0 : index
    %c68 = arith.constant 68 : index
    %105 = vector.load %arg4[%c0_46, %c68] : memref<4x512xf32, #tpu.memory_space<vmem>>, vector<4x256xf32>
    %106 = arith.mulf %7, %105 : vector<4x256xf32>
    %cst_47 = arith.constant dense<0.000000e+00> : vector<256xf32>
    %107 = vector.multi_reduction <add>, %106, %cst_47 [0] : vector<4x256xf32> to vector<256xf32>
    %108 = vector.shape_cast %107 : vector<256xf32> to vector<1x256xf32>
    %109 = arith.mulf %108, %84 : vector<1x256xf32>
    %c0_48 = arith.constant 0 : index
    %c92 = arith.constant 92 : index
    %110 = vector.load %arg4[%c0_48, %c92] : memref<4x512xf32, #tpu.memory_space<vmem>>, vector<4x256xf32>
    %111 = arith.mulf %7, %110 : vector<4x256xf32>
    %cst_49 = arith.constant dense<0.000000e+00> : vector<256xf32>
    %112 = vector.multi_reduction <add>, %111, %cst_49 [0] : vector<4x256xf32> to vector<256xf32>
    %113 = vector.shape_cast %112 : vector<256xf32> to vector<1x256xf32>
    %114 = arith.mulf %113, %36 : vector<1x256xf32>
    %c0_50 = arith.constant 0 : index
    %c94 = arith.constant 94 : index
    %115 = vector.load %arg4[%c0_50, %c94] : memref<4x512xf32, #tpu.memory_space<vmem>>, vector<4x256xf32>
    %116 = arith.mulf %7, %115 : vector<4x256xf32>
    %cst_51 = arith.constant dense<0.000000e+00> : vector<256xf32>
    %117 = vector.multi_reduction <add>, %116, %cst_51 [0] : vector<4x256xf32> to vector<256xf32>
    %118 = vector.shape_cast %117 : vector<256xf32> to vector<1x256xf32>
    %119 = arith.mulf %118, %48 : vector<1x256xf32>
    %c0_52 = arith.constant 0 : index
    %c96 = arith.constant 96 : index
    %120 = vector.load %arg4[%c0_52, %c96] : memref<4x512xf32, #tpu.memory_space<vmem>>, vector<4x256xf32>
    %121 = arith.mulf %7, %120 : vector<4x256xf32>
    %cst_53 = arith.constant dense<0.000000e+00> : vector<256xf32>
    %122 = vector.multi_reduction <add>, %121, %cst_53 [0] : vector<4x256xf32> to vector<256xf32>
    %123 = vector.shape_cast %122 : vector<256xf32> to vector<1x256xf32>
    %124 = arith.mulf %123, %60 : vector<1x256xf32>
    %125 = tpu.concatenate %89, %94, %99, %104, %109, %114, %119, %124 in 0 : vector<1x256xf32>, vector<1x256xf32>, vector<1x256xf32>, vector<1x256xf32>, vector<1x256xf32>, vector<1x256xf32>, vector<1x256xf32>, vector<1x256xf32> -> vector<8x256xf32>
    %c0_54 = arith.constant 0 : index
    %c0_55 = arith.constant 0 : index
    %c0_56 = arith.constant 0 : index
    %126 = vector.load %arg3[%c0_54, %c0_55, %c0_56] : memref<1x32x256xf32, #tpu.memory_space<vmem>>, vector<1x8x256xf32>
    %127 = vector.shape_cast %126 : vector<1x8x256xf32> to vector<8x256xf32>
    %128 = vector.shape_cast %125 : vector<8x256xf32> to vector<1x8x256xf32>
    tpu.vector_store %arg3[%c0_54, %c0_55, %c0_56], %128 {strides = array<i32>} : memref<1x32x256xf32, #tpu.memory_space<vmem>>, vector<1x8x256xf32>,
    %c0_57 = arith.constant 0 : index
    %c98 = arith.constant 98 : index
    %129 = vector.load %arg4[%c0_57, %c98] : memref<4x512xf32, #tpu.memory_space<vmem>>, vector<4x256xf32>
    %130 = arith.mulf %7, %129 : vector<4x256xf32>
    %cst_58 = arith.constant dense<0.000000e+00> : vector<256xf32>
    %131 = vector.multi_reduction <add>, %130, %cst_58 [0] : vector<4x256xf32> to vector<256xf32>
    %132 = vector.shape_cast %131 : vector<256xf32> to vector<1x256xf32>
    %133 = arith.mulf %132, %72 : vector<1x256xf32>
    %c0_59 = arith.constant 0 : index
    %c100 = arith.constant 100 : index
    %134 = vector.load %arg4[%c0_59, %c100] : memref<4x512xf32, #tpu.memory_space<vmem>>, vector<4x256xf32>
    %135 = arith.mulf %7, %134 : vector<4x256xf32>
    %cst_60 = arith.constant dense<0.000000e+00> : vector<256xf32>
    %136 = vector.multi_reduction <add>, %135, %cst_60 [0] : vector<4x256xf32> to vector<256xf32>
    %137 = vector.shape_cast %136 : vector<256xf32> to vector<1x256xf32>
    %138 = arith.mulf %137, %84 : vector<1x256xf32>
    %c0_61 = arith.constant 0 : index
    %c124 = arith.constant 124 : index
    %139 = vector.load %arg4[%c0_61, %c124] : memref<4x512xf32, #tpu.memory_space<vmem>>, vector<4x256xf32>
    %140 = arith.mulf %7, %139 : vector<4x256xf32>
    %cst_62 = arith.constant dense<0.000000e+00> : vector<256xf32>
    %141 = vector.multi_reduction <add>, %140, %cst_62 [0] : vector<4x256xf32> to vector<256xf32>
    %142 = vector.shape_cast %141 : vector<256xf32> to vector<1x256xf32>
    %143 = arith.mulf %142, %36 : vector<1x256xf32>
    %c0_63 = arith.constant 0 : index
    %c126 = arith.constant 126 : index
    %144 = vector.load %arg4[%c0_63, %c126] : memref<4x512xf32, #tpu.memory_space<vmem>>, vector<4x256xf32>
    %145 = arith.mulf %7, %144 : vector<4x256xf32>
    %cst_64 = arith.constant dense<0.000000e+00> : vector<256xf32>
    %146 = vector.multi_reduction <add>, %145, %cst_64 [0] : vector<4x256xf32> to vector<256xf32>
    %147 = vector.shape_cast %146 : vector<256xf32> to vector<1x256xf32>
    %148 = arith.mulf %147, %48 : vector<1x256xf32>
    %c0_65 = arith.constant 0 : index
    %c128_66 = arith.constant 128 : index
    %149 = vector.load %arg4[%c0_65, %c128_66] : memref<4x512xf32, #tpu.memory_space<vmem>>, vector<4x256xf32>
    %150 = arith.mulf %7, %149 : vector<4x256xf32>
    %cst_67 = arith.constant dense<0.000000e+00> : vector<256xf32>
    %151 = vector.multi_reduction <add>, %150, %cst_67 [0] : vector<4x256xf32> to vector<256xf32>
    %152 = vector.shape_cast %151 : vector<256xf32> to vector<1x256xf32>
    %153 = arith.mulf %152, %60 : vector<1x256xf32>
    %c0_68 = arith.constant 0 : index
    %c130 = arith.constant 130 : index
    %154 = vector.load %arg4[%c0_68, %c130] : memref<4x512xf32, #tpu.memory_space<vmem>>, vector<4x256xf32>
    %155 = arith.mulf %7, %154 : vector<4x256xf32>
    %cst_69 = arith.constant dense<0.000000e+00> : vector<256xf32>
    %156 = vector.multi_reduction <add>, %155, %cst_69 [0] : vector<4x256xf32> to vector<256xf32>
    %157 = vector.shape_cast %156 : vector<256xf32> to vector<1x256xf32>
    %158 = arith.mulf %157, %72 : vector<1x256xf32>
    %c0_70 = arith.constant 0 : index
    %c132 = arith.constant 132 : index
    %159 = vector.load %arg4[%c0_70, %c132] : memref<4x512xf32, #tpu.memory_space<vmem>>, vector<4x256xf32>
    %160 = arith.mulf %7, %159 : vector<4x256xf32>
    %cst_71 = arith.constant dense<0.000000e+00> : vector<256xf32>
    %161 = vector.multi_reduction <add>, %160, %cst_71 [0] : vector<4x256xf32> to vector<256xf32>
    %162 = vector.shape_cast %161 : vector<256xf32> to vector<1x256xf32>
    %163 = arith.mulf %162, %84 : vector<1x256xf32>
    %c0_72 = arith.constant 0 : index
    %c156 = arith.constant 156 : index
    %164 = vector.load %arg4[%c0_72, %c156] : memref<4x512xf32, #tpu.memory_space<vmem>>, vector<4x256xf32>
    %165 = arith.mulf %7, %164 : vector<4x256xf32>
    %cst_73 = arith.constant dense<0.000000e+00> : vector<256xf32>
    %166 = vector.multi_reduction <add>, %165, %cst_73 [0] : vector<4x256xf32> to vector<256xf32>
    %167 = vector.shape_cast %166 : vector<256xf32> to vector<1x256xf32>
    %168 = arith.mulf %167, %36 : vector<1x256xf32>
    %169 = tpu.concatenate %133, %138, %143, %148, %153, %158, %163, %168 in 0 : vector<1x256xf32>, vector<1x256xf32>, vector<1x256xf32>, vector<1x256xf32>, vector<1x256xf32>, vector<1x256xf32>, vector<1x256xf32>, vector<1x256xf32> -> vector<8x256xf32>
    %c0_74 = arith.constant 0 : index
    %c8 = arith.constant 8 : index
    %c0_75 = arith.constant 0 : index
    %170 = vector.load %arg3[%c0_74, %c8, %c0_75] : memref<1x32x256xf32, #tpu.memory_space<vmem>>, vector<1x8x256xf32>
    %171 = vector.shape_cast %170 : vector<1x8x256xf32> to vector<8x256xf32>
    %172 = vector.shape_cast %169 : vector<8x256xf32> to vector<1x8x256xf32>
    tpu.vector_store %arg3[%c0_74, %c8, %c0_75], %172 {strides = array<i32>} : memref<1x32x256xf32, #tpu.memory_space<vmem>>, vector<1x8x256xf32>,
    %c0_76 = arith.constant 0 : index
    %c158 = arith.constant 158 : index
    %173 = vector.load %arg4[%c0_76, %c158] : memref<4x512xf32, #tpu.memory_space<vmem>>, vector<4x256xf32>
    %174 = arith.mulf %7, %173 : vector<4x256xf32>
    %cst_77 = arith.constant dense<0.000000e+00> : vector<256xf32>
    %175 = vector.multi_reduction <add>, %174, %cst_77 [0] : vector<4x256xf32> to vector<256xf32>
    %176 = vector.shape_cast %175 : vector<256xf32> to vector<1x256xf32>
    %177 = arith.mulf %176, %48 : vector<1x256xf32>
    %c0_78 = arith.constant 0 : index
    %c160 = arith.constant 160 : index
    %178 = vector.load %arg4[%c0_78, %c160] : memref<4x512xf32, #tpu.memory_space<vmem>>, vector<4x256xf32>
    %179 = arith.mulf %7, %178 : vector<4x256xf32>
    %cst_79 = arith.constant dense<0.000000e+00> : vector<256xf32>
    %180 = vector.multi_reduction <add>, %179, %cst_79 [0] : vector<4x256xf32> to vector<256xf32>
    %181 = vector.shape_cast %180 : vector<256xf32> to vector<1x256xf32>
    %182 = arith.mulf %181, %60 : vector<1x256xf32>
    %c0_80 = arith.constant 0 : index
    %c162 = arith.constant 162 : index
    %183 = vector.load %arg4[%c0_80, %c162] : memref<4x512xf32, #tpu.memory_space<vmem>>, vector<4x256xf32>
    %184 = arith.mulf %7, %183 : vector<4x256xf32>
    %cst_81 = arith.constant dense<0.000000e+00> : vector<256xf32>
    %185 = vector.multi_reduction <add>, %184, %cst_81 [0] : vector<4x256xf32> to vector<256xf32>
    %186 = vector.shape_cast %185 : vector<256xf32> to vector<1x256xf32>
    %187 = arith.mulf %186, %72 : vector<1x256xf32>
    %c0_82 = arith.constant 0 : index
    %c164 = arith.constant 164 : index
    %188 = vector.load %arg4[%c0_82, %c164] : memref<4x512xf32, #tpu.memory_space<vmem>>, vector<4x256xf32>
    %189 = arith.mulf %7, %188 : vector<4x256xf32>
    %cst_83 = arith.constant dense<0.000000e+00> : vector<256xf32>
    %190 = vector.multi_reduction <add>, %189, %cst_83 [0] : vector<4x256xf32> to vector<256xf32>
    %191 = vector.shape_cast %190 : vector<256xf32> to vector<1x256xf32>
    %192 = arith.mulf %191, %84 : vector<1x256xf32>
    %c0_84 = arith.constant 0 : index
    %c188 = arith.constant 188 : index
    %193 = vector.load %arg4[%c0_84, %c188] : memref<4x512xf32, #tpu.memory_space<vmem>>, vector<4x256xf32>
    %194 = arith.mulf %7, %193 : vector<4x256xf32>
    %cst_85 = arith.constant dense<0.000000e+00> : vector<256xf32>
    %195 = vector.multi_reduction <add>, %194, %cst_85 [0] : vector<4x256xf32> to vector<256xf32>
    %196 = vector.shape_cast %195 : vector<256xf32> to vector<1x256xf32>
    %197 = arith.mulf %196, %36 : vector<1x256xf32>
    %c0_86 = arith.constant 0 : index
    %c190 = arith.constant 190 : index
    %198 = vector.load %arg4[%c0_86, %c190] : memref<4x512xf32, #tpu.memory_space<vmem>>, vector<4x256xf32>
    %199 = arith.mulf %7, %198 : vector<4x256xf32>
    %cst_87 = arith.constant dense<0.000000e+00> : vector<256xf32>
    %200 = vector.multi_reduction <add>, %199, %cst_87 [0] : vector<4x256xf32> to vector<256xf32>
    %201 = vector.shape_cast %200 : vector<256xf32> to vector<1x256xf32>
    %202 = arith.mulf %201, %48 : vector<1x256xf32>
    %c0_88 = arith.constant 0 : index
    %c192 = arith.constant 192 : index
    %203 = vector.load %arg4[%c0_88, %c192] : memref<4x512xf32, #tpu.memory_space<vmem>>, vector<4x256xf32>
    %204 = arith.mulf %7, %203 : vector<4x256xf32>
    %cst_89 = arith.constant dense<0.000000e+00> : vector<256xf32>
    %205 = vector.multi_reduction <add>, %204, %cst_89 [0] : vector<4x256xf32> to vector<256xf32>
    %206 = vector.shape_cast %205 : vector<256xf32> to vector<1x256xf32>
    %207 = arith.mulf %206, %60 : vector<1x256xf32>
    %c0_90 = arith.constant 0 : index
    %c194 = arith.constant 194 : index
    %208 = vector.load %arg4[%c0_90, %c194] : memref<4x512xf32, #tpu.memory_space<vmem>>, vector<4x256xf32>
    %209 = arith.mulf %7, %208 : vector<4x256xf32>
    %cst_91 = arith.constant dense<0.000000e+00> : vector<256xf32>
    %210 = vector.multi_reduction <add>, %209, %cst_91 [0] : vector<4x256xf32> to vector<256xf32>
    %211 = vector.shape_cast %210 : vector<256xf32> to vector<1x256xf32>
    %212 = arith.mulf %211, %72 : vector<1x256xf32>
    %213 = tpu.concatenate %177, %182, %187, %192, %197, %202, %207, %212 in 0 : vector<1x256xf32>, vector<1x256xf32>, vector<1x256xf32>, vector<1x256xf32>, vector<1x256xf32>, vector<1x256xf32>, vector<1x256xf32>, vector<1x256xf32> -> vector<8x256xf32>
    %c0_92 = arith.constant 0 : index
    %c16 = arith.constant 16 : index
    %c0_93 = arith.constant 0 : index
    %214 = vector.load %arg3[%c0_92, %c16, %c0_93] : memref<1x32x256xf32, #tpu.memory_space<vmem>>, vector<1x8x256xf32>
    %215 = vector.shape_cast %214 : vector<1x8x256xf32> to vector<8x256xf32>
    %216 = vector.shape_cast %213 : vector<8x256xf32> to vector<1x8x256xf32>
    tpu.vector_store %arg3[%c0_92, %c16, %c0_93], %216 {strides = array<i32>} : memref<1x32x256xf32, #tpu.memory_space<vmem>>, vector<1x8x256xf32>,
    %c0_94 = arith.constant 0 : index
    %c196 = arith.constant 196 : index
    %217 = vector.load %arg4[%c0_94, %c196] : memref<4x512xf32, #tpu.memory_space<vmem>>, vector<4x256xf32>
    %218 = arith.mulf %7, %217 : vector<4x256xf32>
    %cst_95 = arith.constant dense<0.000000e+00> : vector<256xf32>
    %219 = vector.multi_reduction <add>, %218, %cst_95 [0] : vector<4x256xf32> to vector<256xf32>
    %220 = vector.shape_cast %219 : vector<256xf32> to vector<1x256xf32>
    %221 = arith.mulf %220, %84 : vector<1x256xf32>
    %cst_96 = arith.constant 0.000000e+00 : f32
    %222 = vector.broadcast %cst_96 : f32 to vector<1x256xf32>
    %223 = tpu.concatenate %221, %222, %222, %222, %222, %222, %222, %222 in 0 : vector<1x256xf32>, vector<1x256xf32>, vector<1x256xf32>, vector<1x256xf32>, vector<1x256xf32>, vector<1x256xf32>, vector<1x256xf32>, vector<1x256xf32> -> vector<8x256xf32>
    %c0_97 = arith.constant 0 : index
    %c24 = arith.constant 24 : index
    %c0_98 = arith.constant 0 : index
    %224 = vector.load %arg3[%c0_97, %c24, %c0_98] : memref<1x32x256xf32, #tpu.memory_space<vmem>>, vector<1x8x256xf32>
    %225 = vector.shape_cast %224 : vector<1x8x256xf32> to vector<8x256xf32>
    %226 = vector.shape_cast %223 : vector<8x256xf32> to vector<1x8x256xf32>
    tpu.vector_store %arg3[%c0_97, %c24, %c0_98], %226 {strides = array<i32>} : memref<1x32x256xf32, #tpu.memory_space<vmem>>, vector<1x8x256xf32>,
    return
  }
  func.func @transform_0(%arg0: i32) -> (i32, i32, i32) {
    %c0_i32 = arith.constant 0 : i32
    %c0_i32_0 = arith.constant 0 : i32
    %c0_i32_1 = arith.constant 0 : i32
    return %arg0, %c0_i32, %c0_i32_0 : i32, i32, i32
  }
  func.func @transform_1(%arg0: i32) -> (i32, i32, i32) {
    %c0_i32 = arith.constant 0 : i32
    %c0_i32_0 = arith.constant 0 : i32
    %c0_i32_1 = arith.constant 0 : i32
    return %arg0, %c0_i32, %c0_i32_0 : i32, i32, i32
  }
  func.func @transform_2(%arg0: i32) -> (i32, i32, i32) {
    %c0_i32 = arith.constant 0 : i32
    %c0_i32_0 = arith.constant 0 : i32
    %c0_i32_1 = arith.constant 0 : i32
    return %arg0, %c0_i32, %c0_i32_0 : i32, i32, i32
  }
}

</mosaic_0001>

<bundles_post_ra>
// kernel: tpu_custom_call.1
= control target key start
LH: loop header
LB: loop body
LE: loop exit
PB: predicated region body
PF: predicated region fallthrough
CT: control target
= control target key end

     0   :  { %7 = vsyncpa [#allocation4], 0  ;;  %s2193_s0 = inlined_call_operand.hbm [shape: f32[2,4,256], index: 0, kind: input, shape index: {}]   ;;  %s2194_s1 = inlined_call_operand.hbm [shape: f32[2,4,256], index: 1, kind: input, shape index: {}]   ;;  %s2195_s2 = inlined_call_operand.hbm [shape: f32[2,32,256], index: 2, kind: output, shape index: {}]  }
   0x1   :  { %9 = vsyncpa [#allocation4 + $0x1], 0 }
   0x2   :  { %10 = vsyncpa [#allocation7], 0 }
   0x3   :  { %12 = vsyncpa [#allocation7 + $0x1], 0 }
   0x4   :  { %13 = vsyncpa [#allocation5], 0 }
   0x5   :  { %15 = vsyncpa [#allocation5 + $0x1], 0  ;;  %s1482_s9 = smov 0   ;;  %s1484_s10 = smov 0  }
   0x6   :  { %s1486_s11 = smov 0   ;;  %s1488_s12 = smov 0  }
   0x7 LB: > { %s1503_s13 = sadd.s32 4294967295, %s1440_s12   ;;  %s1215_s14 = sadd.s32 4294967294, %s1440_s12   ;;  %s1440_s12 = sphi %s1488_s12, %s2214_s12   ;;  %s1436_s11 = sphi %s1486_s11, %s2213_s11   ;;  %s1432_s10 = sphi %s1484_s10, %s2212_s10   ;;  %s1428_s9 = sphi %s1482_s9, %s2211_s9  }
   0x8   : > { %s1507_s15 = sadd.s32 1, %s1440_s12   ;;  %s28_s16 = sadd.s32 1, %s1436_s11 }
   0x9   : > { %s25_s17 = ssub.s32 %s1440_s12, %s1507_s15  ;;  %p35_p0 = scmp.ne.s32.totalorder %s1436_s11, %s1432_s10 }
   0xa   : > { %p26_p1 = scmp.eq.s32.totalorder %s25_s17, 0  ;;  %p36_p2 = scmp.eq.s32.totalorder %s1440_s12, 0 }
   0xb   : > { %p41_p3 = scmp.ne.s32.totalorder %s1432_s10, %s1428_s9  ;;  %p42_p4 = scmp.eq.s32.totalorder %s1503_s13, 0 }
   0xc   : > { %s1519_s18 = scalar_select %p26_p1, %s1436_s11, %s28_s16  }
   0xd   : > { %p1521_p5 = por %p36_p2, %p35_p0  ;;  %p1525_p6 = por %p42_p4, %p41_p3 }
   0xe   : > { %p91_p7 = scmp.eq.s32.totalorder %s1503_s13, 1  ;;  %p97_p8 = scmp.eq.s32.totalorder %s1215_s14, 1 }
   0xf   : > { %s2199_s20 = scalar_select %p1525_p6, 1, 0 }
  0x10   : > { %p1253_p10 = scmp.lt.s32.totalorder %s1440_s12, 2  ;;  %p1532_p11 = por %p91_p7, %p35_p0 }
  0x11   : > { %p1536_p12 = por %p97_p8, %p41_p3  ;;  %s1541_s23 = sand.u32 1, %s1436_s11  }
  0x12   : > { %s2200_s21 = scalar_select %p1532_p11, 1, 0 }
  0x13   : > { %s2201_s22 = scalar_select %p1536_p12, 1, 0 }
  0x14   : > { %s1233_s24 = sshll.u32 %s1440_s12, 7  ;;  %s1218_s25 = sshll.u32 %s1541_s23, 3 }
  0x15   : > { %s1550_s28 = scalar_lea.hbm %s2193_s0, %s1233_s24  ;;  %s121_s29 = scalar_lea.vmem [#allocation3], %s1218_s25 }
  0x16   : > { %s129_s30 = sshll.u32 %s121_s29, 4  ;;  %p1556_p13 = pnand %p1253_p10, %p1521_p5  ;;  %s1560_s30 = int_to_ptr.vmem [resolvable:$true] %s129_s30 }
  0x17   : > { %s118_s4 = scalar_lea.sflag [#allocation4], %s1541_s23  ;;  %s1310_s5 = scalar_lea.hbm %s1550_s28, 128 }
  0x18   : > { %p1311_p2 = scmp.ne.s32.totalorder %s1550_s28, %s1310_s5  ;;  %p1312_p3 = pneg %p1556_p13 }
  0x19   : > { %s1315_s8 = scalar_lea.hbm %s2193_s0, 256  ;;  %p1316_p5 = scmp.lt.u32.totalorder %s1550_s28, %s2193_s0 }
  0x1a   : > { %p1313_p4 = pnand %p1312_p3, %p1311_p2  ;;  %p1317_p8 = scmp.lt.u32.totalorder %s1315_s8, %s1310_s5 }
  0x1b   : > { %p1319_p9 = scmp.lt.u32.totalorder %s1310_s5, %s1550_s28 }
  0x1c   : > { %p1314_p7 = pneg %p1313_p4  ;;  %p1318_p10 = por %p1317_p8, %p1316_p5 }
  0x1e   : > { %p1320_p0 = por %p1319_p9, %p1318_p10 }
  0x20   : > { %p1321_p1 = pnand %p1320_p0, %p1314_p7 }
  0x22   : > { %1324 = shalt.err (!%p1321_p1)
}
  0x23   : > { %s1325_s17 = scalar_lea.vmem %s1560_s30, 128  ;;  %s1442_s19 = smov [#allocation3]  }
  0x24   : > { %p1326_p2 = scmp.ne.s32.totalorder %s1560_s30, %s1325_s17  ;;  %s1330_s26 = sshll.u32 %s1442_s19, 4  ;;  %s1331_s26 = int_to_ptr.vmem [resolvable:$false] %s1330_s26 }
  0x25   : > { %s1332_s27 = scalar_lea.vmem %s1331_s26, 256  ;;  %p1333_p11 = scmp.lt.s32.totalorder %s1560_s30, %s1331_s26 }
  0x26   : > { %p1328_p4 = pnand %p1326_p2, %p1312_p3  ;;  %p1334_p5 = scmp.lt.s32.totalorder %s1332_s27, %s1325_s17 }
  0x28   : > { %p1329_p12 = pneg %p1328_p4  ;;  %p1335_p8 = por %p1334_p5, %p1333_p11 }
  0x2a   : > { %p1336_p9 = pnand %p1335_p8, %p1329_p12 }
  0x2c   : > { %1339 = shalt.err (!%p1336_p9)
}
  0x2d   : > { %1245 = dma.hbm_to_vmem [thread:$0]  (!%p1556_p13), %s1550_s28, 128, %s1560_s30, %s118_s4  }
  0x2e   : > { %p2203_p0 = scmp.lt.s32.totalorder %s1440_s12, 3  ;;  %p2204_p1 = scmp.ge.s32.totalorder %s1440_s12, 1 }
  0x2f   : > { %s1603_s7 = scalar_lea.hbm %s2194_s1, %s1233_s24  ;;  %s140_s8 = scalar_lea.vmem [#allocation6], %s1218_s25 }
  0x30   : > { %p1594_p7 = pnand %p2204_p1, %p2203_p0  ;;  %s148_s14 = sshll.u32 %s140_s8, 4  ;;  %s149_s14 = int_to_ptr.vmem [resolvable:$true] %s148_s14 }
  0x31   : > { %s137_s28 = scalar_lea.sflag [#allocation7], %s1541_s23  ;;  %s1340_s30 = scalar_lea.hbm %s1603_s7, 128 }
  0x32   : > { %s2205_s29 = scalar_select %p1594_p7, 1, 0 }
  0x33   : > { %p1341_p11 = scmp.ne.s32.totalorder %s1603_s7, %s1340_s30  ;;  %s1345_s24 = scalar_lea.hbm %s2194_s1, 256 }
  0x34   : > { %p1346_p2 = scmp.lt.u32.totalorder %s1603_s7, %s2194_s1  ;;  %p1347_p4 = scmp.lt.u32.totalorder %s1345_s24, %s1340_s30 }
  0x35   : > { %p1343_p12 = pnand %p1341_p11, %p1312_p3  ;;  %p1349_p8 = scmp.lt.u32.totalorder %s1340_s30, %s1603_s7 }
  0x36   : > { %p1348_p5 = por %p1347_p4, %p1346_p2 }
  0x37   : > { %p1344_p10 = pneg %p1343_p12 }
  0x38   : > { %p1350_p9 = por %p1349_p8, %p1348_p5 }
  0x3a   : > { %p1351_p0 = pnand %p1350_p9, %p1344_p10 }
  0x3c   : > { %1354 = shalt.err (!%p1351_p0)
}
  0x3d   : > { %s1355_s23 = scalar_lea.vmem %s149_s14, 128  ;;  %s1443_s25 = smov [#allocation6]  }
  0x3e   : > { %p1356_p1 = scmp.ne.s32.totalorder %s149_s14, %s1355_s23  ;;  %s1360_s26 = sshll.u32 %s1443_s25, 4  ;;  %s1361_s26 = int_to_ptr.vmem [resolvable:$false] %s1360_s26 }
  0x3f   : > { %s1362_s27 = scalar_lea.vmem %s1361_s26, 256  ;;  %p1363_p6 = scmp.lt.s32.totalorder %s149_s14, %s1361_s26 }
  0x40   : > { %p1358_p11 = pnand %p1356_p1, %p1312_p3  ;;  %p1364_p7 = scmp.lt.s32.totalorder %s1362_s27, %s1355_s23 }
  0x42   : > { %p1359_p12 = pneg %p1358_p11  ;;  %p1365_p2 = por %p1364_p7, %p1363_p6 }
  0x44   : > { %p1366_p4 = pnand %p1365_p2, %p1359_p12 }
  0x46   : > { %1369 = shalt.err (!%p1366_p4)
}
  0x47   : > { %1248 = dma.hbm_to_vmem [thread:$0]  (!%p1556_p13), %s1603_s7, 128, %s149_s14, %s137_s28  }
  0x48   : > { %p2206_p10 = scmp.ne.s32.totalorder %s2205_s29, 0 }
  0x49   : > { %s1630_s5 = sand.u32 (!%p2206_p10), 1, %s1432_s10   ;;  %p2207_p6 = scmp.ne.s32.totalorder (!%p2206_p10), %s2199_s20, 0 }
  0x4a   : > { %157 = sbr.rel (%p2206_p10) target bundleno = 385 (0x181), region = 28  ;;  %s1225_s6 = sshll.u32 (!%p2206_p10), %s1630_s5, 3 }
  0x4b   : > { %s160_s8 = scalar_lea.sflag (!%p2206_p10), [#allocation4], %s1630_s5  ;;  %s1634_s30 = scalar_lea.vmem (!%p2206_p10), [#allocation3], %s1225_s6 }
  0x51   : > { %1415 = dma.done.wait (%p2207_p6), %s160_s8, 128  }
  0x52   : > { %1417 = vsyncadd (%p2207_p6), %s160_s8, 4294967168  ;;  %s169_s3 = scalar_lea.sflag [#allocation7], %s1630_s5  ;;  %s172_s29 = scalar_lea.vmem [#allocation6], %s1225_s6 }
  0x53   : > { %1419 = dma.done.wait (%p2207_p6), %s169_s3, 128  }
  0x54   : > { %1421 = vsyncadd (%p2207_p6), %s169_s3, 4294967168  ;;  %v1444_v0 = vmov 0.0   ;;  %v1647_v1 = vld [vmem:[%s172_s29] sm:$0xff]  ;;  %s1445_s7 = smov 98   ;;  %v203_v3 = vlaneseq  ;;  %s1446_s20 = smov 66   ;;  %v1743_v25 = vld [vmem:[%s1634_s30] sm:$0xff] }
  0x55   : > { %199 = vst [vmem:[#allocation2 + $0xc] sm:$0xf] %v1444_v0  ;;  %198 = vst [vmem:[#allocation2] sm:$0xf] %v1444_v0  ;;  %s1447_s14 = smov 68   ;;  %s1448_s28 = smov 30  }
  0x56   : > { %201 = vst [vmem:[#allocation2 + $0x4] sm:$0xff] %v1647_v1  ;;  %v204_v4 = vand.u32 127, %v203_v3  ;;  %s1449_s4 = smov 28   ;;  %s1450_s16 = smov 96   ;;  %vm288_vm6 = vcmask 1043456   ;;  %vm290_vm7 = vcmask 556032  }
  0x57   : > { %s1451_s24 = smov 60   ;;  %s1452_s17 = smov 64   ;;  %vm320_vm8 = vcmask 539648   ;;  %vm556_vm9 = vcmask 244736   ;;  %vm586_vm12 = vcmask 228352   ;;  %vm811_vm13 = vcmask 801792  }
  0x58   : > { %v205_v6 = vadd.s32 128, %v204_v4  ;;  %v1660_v7 = vand.u32 15, %v204_v4  ;;  %s1453_s19 = smov 4   ;;  %s1454_s23 = smov 94   ;;  %vm841_vm14 = vcmask 785408   ;;  %vm410_vm15 = vcmask 490496  }
  0x59   : > { %s1455_s25 = smov 62   ;;  %s1456_s26 = smov 2  }
  0x5a   : > { %v1664_v9 = vand.u32 15, %v205_v6  ;;  %v258_v10 = vadd.s32 2, %v1660_v7  ;;  %v240_v15 = vadd.s32 4294967294, %v1660_v7  ;;  %v230_v19 = vadd.s32 4294967292, %v1660_v7  ;;  %s1457_s27 = smov 92   ;;  %s1458_s6 = smov 36  }
  0x5b   : > { %s1459_s8 = smov 126   ;;  %s1460_s3 = smov 34   ;;  %v268_v44 = vadd.s32 4, %v1660_v7 }
  0x5c   : > { %v1649_v2 = vld [vmem:[#allocation2 + $0xc] sm:$0xf]  ;;  %v259_v11 = vadd.s32 2, %v1664_v9  ;;  %vm262_vm0 = vcmp.lt.s32.totalorder %v258_v10, 16  ;;  %v241_v16 = vadd.s32 4294967294, %v1664_v9  ;;  %vm242_vm2 = vcmp.ge.s32.totalorder %v240_v15, 0 }
  0x5d   : > { %806 = vrot.lane.b32.xlu1 %v1649_v2, %s1445_s7  ;;  %v1654_v5 = vld [vmem:[#allocation2] sm:$0xff]  ;;  %v1662_v8 = vld [vmem:[#allocation2 + $0x8] sm:$0xf]  ;;  %v1673_v13 = vsel %vm262_vm0, 0.25, %v1444_v0  ;;  %v1682_v17 = vsel %vm242_vm2, 0.25, %v1444_v0  ;;  %v231_v21 = vadd.s32 4294967292, %v1664_v9 }
  0x5e   : > { %282 = vrot.lane.b32.xlu0 %v1654_v5, %s1447_s14  ;;  %v546_v12 = vld [vmem:[#allocation2 + $0x8] sm:$0xf]  ;;  %vm263_vm1 = vcmp.lt.s32.totalorder %v259_v11, 16  ;;  %vm243_vm3 = vcmp.ge.s32.totalorder %v241_v16, 0  ;;  %v1057_v20 = vld [vmem:[#allocation2 + $0xc] sm:$0xf] }
  0x5f   : > { %v1676_v14 = vsel %vm263_vm1, 0.25, %v1444_v0  ;;  %v1685_v18 = vsel %vm243_vm3, 0.25, %v1444_v0  ;;  %vm232_vm4 = vcmp.ge.s32.totalorder %v230_v19, 0  ;;  %vm233_vm5 = vcmp.ge.s32.totalorder %v231_v21, 0  ;;  %v691_v24 = vld [vmem:[#allocation2 + $0xc] sm:$0xf] }
  0x60   : > { %v1694_v22 = vsel %vm232_vm4, 0.25, %v1444_v0  ;;  %v1698_v23 = vsel %vm233_vm5, 0.25, %v1444_v0  ;;  %s1461_s29 = smov 124   ;;  %v669_v26 = vld [vmem:[#allocation2 + $0x4] sm:$0xff]  ;;  %v269_v45 = vadd.s32 4, %v1664_v9  ;;  %vm272_vm10 = vcmp.lt.s32.totalorder %v268_v44, 16 }
  0x61   : > { %313 = vrot.lane.b32.xlu1 %v1654_v5, %s1446_s20  ;;  %v670_v27 = vmul.f32 %v669_v26, %v1743_v25  ;;  %vm523_vm0 = vcmask 1040384   ;;  %vm350_vm1 = vcmask 523264   ;;  %vm616_vm2 = vcmask 31744   ;;  %p2208_p3 = scmp.ne.s32.totalorder %s2200_s21, 0 }
  0x62   : > { %284 = vrot.lane.b32.xlu0 %v1662_v8, %s1447_s14  ;;  %vm273_vm11 = vcmp.lt.s32.totalorder %v269_v45, 16  ;;  %vm871_vm3 = vcmask 769024   ;;  %vm526_vm4 = vcmask 1041408   ;;  %vm529_vm5 = vcmask 1042432  }
  0x63   : > { %v672_v28 = vcombine.high %v670_v27, %v670_v27  ;;  %v674_v29 = vsel %vm288_vm6, %v670_v27, 0.0  ;;  %v1763_v3 = vsel %vm273_vm11, 0.25, %v1444_v0  ;;  %vm540_vm11 = vcmask 1046528  }
  0x64   : > { %v675_v31 = vrot.slane %v674_v29, 4 }
  0x65   : > { %315 = vrot.lane.b32.xlu1 %v1662_v8, %s1446_s20  ;;  %v681_v30 = vsel %vm288_vm6, %v672_v28, 0.0 }
  0x66   : > { %549 = vrot.lane.b32.xlu0 %v1654_v5, %s1448_s28  ;;  %v682_v32 = vrot.slane %v681_v30, 4  ;;  %v676_v33 = vadd.f32 %v675_v31, %v674_v29 }
  0x68   : > { %v683_v34 = vadd.f32 %v682_v32, %v681_v30  ;;  %v677_v36 = vrot.slane %v676_v33, 2 }
  0x69   : > { %551 = vrot.lane.b32.xlu1 %v546_v12, %s1448_s28 }
  0x6a   : > { %579 = vrot.lane.b32.xlu0 %v1654_v5, %s1449_s4  ;;  %v684_v37 = vrot.slane %v683_v34, 2  ;;  %v678_v38 = vadd.f32 %v677_v36, %v676_v33 }
  0x6c   : > { %v685_v41 = vadd.f32 %v684_v37, %v683_v34  ;;  %v679_v42 = vrot.slane %v678_v38, 1 }
  0x6d   : > { %581 = vrot.lane.b32.xlu1 %v546_v12, %s1449_s4 }
  0x6e   : > { %804 = vrot.lane.b32.xlu0 %v1647_v1, %s1445_s7  ;;  %s1462_s7 = smov 32   ;;  %v686_v48 = vrot.slane %v685_v41, 1  ;;  %v680_v52 = vadd.f32 %v679_v42, %v678_v38 }
  0x70   : > { %v687_v58 = vadd.f32 %v686_v48, %v685_v41  ;;  %v1765_v4 = vmul.f32 0.25, %v680_v52 }
  0x71   : > { %836 = vrot.lane.b32.xlu1 %v1649_v2, %s1450_s16 }
  0x72   : > { %834 = vrot.lane.b32.xlu0 %v1647_v1, %s1450_s16  ;;  %v1770_v15 = vmul.f32 0.25, %v687_v58 }
  0x75   : > { %1062 = vrot.lane.b32.xlu1 %v1057_v20, %s1451_s24 }
  0x76   : > { %1060 = vrot.lane.b32.xlu0 %v1647_v1, %s1451_s24 }
  0x79   : > { %345 = vrot.lane.b32.xlu1 %v1662_v8, %s1452_s17 }
  0x7a   : > { %343 = vrot.lane.b32.xlu0 %v1654_v5, %s1452_s17 }
  0x7d   : > { %611 = vrot.lane.b32.xlu1 %v546_v12, %s1453_s19 }
  0x7e   : > { %609 = vrot.lane.b32.xlu0 %v1654_v5, %s1453_s19 }
  0x81   : > { %866 = vrot.lane.b32.xlu1 %v1649_v2, %s1454_s23 }
  0x82   : > { %864 = vrot.lane.b32.xlu0 %v1647_v1, %s1454_s23  ;;  %s1464_s23 = smov [#allocation8]  }
  0x85   : > { %375 = vrot.lane.b32.xlu1 %v1662_v8, %s1455_s25 }
  0x86   : > { %373 = vrot.lane.b32.xlu0 %v1654_v5, %s1455_s25 }
  0x89   : > { %641 = vrot.lane.b32.xlu1 %v546_v12, %s1456_s26 }
  0x8a   : > { %639 = vrot.lane.b32.xlu0 %v1654_v5, %s1456_s26 }
  0x8d   : > { %896 = vrot.lane.b32.xlu1 %v1649_v2, %s1457_s27 }
  0x8e   : > { %894 = vrot.lane.b32.xlu0 %v1647_v1, %s1457_s27 }
  0x91   : > { %405 = vrot.lane.b32.xlu1 %v1662_v8, %s1451_s24 }
  0x92   : > { %403 = vrot.lane.b32.xlu0 %v1654_v5, %s1451_s24 }
  0x95   : > { %926 = vrot.lane.b32.xlu1 %v1649_v2, %s1447_s14 }
  0x96   : > { %924 = vrot.lane.b32.xlu0 %v1647_v1, %s1447_s14  ;;  %s1227_s14 = sshll.u32 %s1630_s5, 6 }
  0x97   : > { %s1871_s28 = scalar_lea.vmem [#allocation8], %s1227_s14 }
  0x98   : > { %s1119_s4 = sshll.u32 %s1871_s28, 4  ;;  %s2144_s4 = int_to_ptr.vmem [resolvable:$true] %s1119_s4 }
  0x99   : > { %435 = vrot.lane.b32.xlu1 %v1662_v8, %s1458_s6  ;;  %s1370_s19 = scalar_lea.vmem %s2144_s4, 1024 }
  0x9a   : > { %433 = vrot.lane.b32.xlu0 %v1654_v5, %s1458_s6  ;;  %p1371_p13 = scmp.ne.s32.totalorder %s2144_s4, %s1370_s19 }
  0x9c   : > { %p1372_p7 = pnand %p1371_p13, %p2208_p3 }
  0x9d   : > { %696 = vrot.lane.b32.xlu1 %v691_v24, %s1459_s8 }
  0x9e   : > { %694 = vrot.lane.b32.xlu0 %v1647_v1, %s1459_s8  ;;  %p1373_p5 = pneg %p1372_p7 }
  0xa1   : > { %955 = vrot.lane.b32.xlu1 %v1649_v2, %s1446_s20 }
  0xa2   : > { %953 = vrot.lane.b32.xlu0 %v1647_v1, %s1446_s20  ;;  %s1463_s20 = smov 100  }
  0xa5   : > { %465 = vrot.lane.b32.xlu1 %v1662_v8, %s1460_s3 }
  0xa6   : > { %463 = vrot.lane.b32.xlu0 %v1654_v5, %s1460_s3 }
  0xa9   : > { %726 = vrot.lane.b32.xlu1 %v691_v24, %s1461_s29 }
  0xaa   : > { %724 = vrot.lane.b32.xlu0 %v1647_v1, %s1461_s29 }
  0xad   : > { %984 = vrot.lane.b32.xlu1 %v1649_v2, %s1452_s17 }
  0xae   : > { %982 = vrot.lane.b32.xlu0 %v1647_v1, %s1452_s17  ;;  %s1106_s17 = scalar_lea.sflag [#allocation5], %s1630_s5 }
  0xb1   : > { %495 = vrot.lane.b32.xlu1 %v1662_v8, %s1462_s7 }
  0xb2   : > { %493 = vrot.lane.b32.xlu0 %v1654_v5, %s1462_s7 }
  0xb5   : > { %756 = vrot.lane.b32.xlu1 %v691_v24, %s1463_s20 }
  0xb6   : > { %754 = vrot.lane.b32.xlu0 %v1647_v1, %s1463_s20 }
  0xb9   : > { %1013 = vrot.lane.b32.xlu1 %v1649_v2, %s1455_s25  ;;  %v1760_v2 = vsel %vm272_vm10, 0.25, %v1444_v0  ;;  %vm537_vm10 = vcmask 1045504  }
  0xba   : > { %1011 = vrot.lane.b32.xlu0 %v1647_v1, %s1455_s25  ;;  %s1374_s25 = sshll.u32 %s1464_s23, 4  ;;  %s1375_s25 = int_to_ptr.vmem [resolvable:$false] %s1374_s25 }
  0xbb   : > { %s1376_s26 = scalar_lea.vmem %s1375_s25, 2048  ;;  %p1377_p8 = scmp.lt.s32.totalorder %s2144_s4, %s1375_s25 }
  0xbc   : > { %p1378_p9 = scmp.lt.s32.totalorder %s1376_s26, %s1370_s19 }
  0xbe   : > { %p1379_p0 = por %p1378_p9, %p1377_p8 }
  0xc0   : > { %p1380_p1 = pnand %p1379_p0, %p1373_p5 }
  0xcf   : > { %v1748_v35 = vpop.permute.xlu1 %806 }
  0xd0   : > { %v283_v40 = vpop.permute.xlu0 %282  ;;  %v809_v1 = vrot.slane %v1748_v35, 4 }
  0xd1   : > { %v286_v49 = vrot.slane %v283_v40, 4 }
  0xd3   : > { %v314_v39 = vpop.permute.xlu1 %313 }
  0xd4   : > { %v317_v43 = vrot.slane %v314_v39, 4  ;;  %v285_v47 = vpop.permute.xlu0 %284 }
  0xd5   : > { %v287_v51 = vrot.slane %v285_v47, 4 }
  0xd7   : > { %v316_v46 = vpop.permute.xlu1 %315  ;;  %v289_v54 = vsel %vm288_vm6, %v286_v49, %v287_v51 }
  0xd8   : > { %v318_v50 = vrot.slane %v316_v46, 4  ;;  %v550_v56 = vpop.permute.xlu0 %549  ;;  %v291_v57 = vsel %vm290_vm7, %v283_v40, %v289_v54 }
  0xd9   : > { %v553_v61 = vrot.slane %v550_v56, 4  ;;  %v293_v62 = vmul.f32 %v291_v57, %v1743_v25 }
  0xda   : > { %v319_v53 = vsel %vm288_vm6, %v317_v43, %v318_v50 }
  0xdb   : > { %v552_v55 = vpop.permute.xlu1 %551  ;;  %v321_v59 = vsel %vm320_vm8, %v314_v39, %v319_v53  ;;  %v295_v6 = vcombine.high %v293_v62, %v293_v62  ;;  %v297_v7 = vsel %vm288_vm6, %v293_v62, 0.0 }
  0xdc   : > { %v554_v60 = vrot.slane %v552_v55, 4  ;;  %v323_v63 = vmul.f32 %v321_v59, %v1743_v25  ;;  %v580_v11 = vpop.permute.xlu0 %579  ;;  %v298_v12 = vrot.slane %v297_v7, 4 }
  0xdd   : > { %v583_v20 = vrot.slane %v580_v11, 4  ;;  %v304_v21 = vsel %vm288_vm6, %v295_v6, 0.0 }
  0xde   : > { %v555_v5 = vsel %vm288_vm6, %v553_v61, %v554_v60  ;;  %v325_v8 = vcombine.high %v323_v63, %v323_v63  ;;  %v327_v16 = vsel %vm288_vm6, %v323_v63, 0.0  ;;  %v299_v24 = vadd.f32 %v298_v12, %v297_v7 }
  0xdf   : > { %v557_v9 = vsel %vm556_vm9, %v550_v56, %v555_v5  ;;  %v582_v10 = vpop.permute.xlu1 %581  ;;  %v305_v26 = vrot.slane %v304_v21, 4  ;;  %v328_v27 = vrot.slane %v327_v16, 4  ;;  %vm534_vm9 = vcmask 1044480  }
  0xe0   : > { %v559_v0 = vmul.f32 %v557_v9, %v1743_v25  ;;  %v584_v19 = vrot.slane %v582_v10, 4  ;;  %v1776_v28 = vsel %vm288_vm6, %v325_v8, 0.0  ;;  %v805_v35 = vpop.permute.xlu0 %804  ;;  %v300_v37 = vrot.slane %v299_v24, 2 }
  0xe1   : > { %v335_v32 = vrot.slane %v1776_v28, 4  ;;  %v1782_v38 = vadd.f32 %v305_v26, %v304_v21  ;;  %v808_v41 = vrot.slane %v805_v35, 4  ;;  %v1791_v50 = vadd.f32 %v328_v27, %v327_v16 }
  0xe2   : > { %v561_v29 = vcombine.high %v559_v0, %v559_v0  ;;  %v563_v30 = vsel %vm288_vm6, %v559_v0, 0.0  ;;  %v585_v31 = vsel %vm288_vm6, %v583_v20, %v584_v19  ;;  %v1786_v45 = vadd.f32 %v300_v37, %v299_v24 }
  0xe3   : > { %v564_v33 = vrot.slane %v563_v30, 4  ;;  %v587_v34 = vsel %vm586_vm12, %v580_v11, %v585_v31  ;;  %v837_v36 = vpop.permute.xlu1 %836  ;;  %v307_v46 = vrot.slane %v1782_v38, 2  ;;  %v810_v49 = vsel %vm288_vm6, %v808_v41, %v809_v1 }
  0xe4   : > { %v570_v39 = vsel %vm288_vm6, %v561_v29, 0.0  ;;  %v589_v40 = vmul.f32 %v587_v34, %v1743_v25  ;;  %v839_v42 = vrot.slane %v837_v36, 4  ;;  %v812_v54 = vsel %vm811_vm13, %v805_v35, %v810_v49  ;;  %v835_v55 = vpop.permute.xlu0 %834 }
  0xe5   : > { %v565_v43 = vadd.f32 %v564_v33, %v563_v30  ;;  %v571_v44 = vrot.slane %v570_v39, 4  ;;  %v814_v58 = vmul.f32 %v812_v54, %v1743_v25  ;;  %v838_v59 = vrot.slane %v835_v55, 4 }
  0xe6   : > { %v591_v47 = vcombine.high %v589_v40, %v589_v40  ;;  %v593_v48 = vsel %vm288_vm6, %v589_v40, 0.0  ;;  %v302_v8 = vrot.slane %v1786_v45, 1  ;;  %vm380_vm12 = vcmask 506880  }
  0xe7   : > { %v566_v51 = vrot.slane %v565_v43, 2  ;;  %v572_v52 = vadd.f32 %v571_v44, %v570_v39  ;;  %v594_v53 = vrot.slane %v593_v48, 4  ;;  %v1063_v56 = vpop.permute.xlu1 %1062  ;;  %v816_v5 = vcombine.high %v814_v58, %v814_v58 }
  0xe8   : > { %v600_v57 = vsel %vm288_vm6, %v591_v47, 0.0  ;;  %v1065_v60 = vrot.slane %v1063_v56, 4  ;;  %v818_v6 = vsel %vm288_vm6, %v814_v58, 0.0  ;;  %v840_v7 = vsel %vm288_vm6, %v838_v59, %v839_v42  ;;  %v1061_v16 = vpop.permute.xlu0 %1060 }
  0xe9   : > { %v567_v61 = vadd.f32 %v566_v51, %v565_v43  ;;  %v573_v62 = vrot.slane %v572_v52, 2  ;;  %v595_v63 = vadd.f32 %v594_v53, %v593_v48  ;;  %v601_v1 = vrot.slane %v600_v57, 4 }
  0xea   : > { %v819_v19 = vrot.slane %v818_v6, 4  ;;  %v825_v20 = vsel %vm288_vm6, %v816_v5, 0.0  ;;  %v842_v21 = vsel %vm841_vm14, %v835_v55, %v840_v7  ;;  %v1064_v24 = vrot.slane %v1061_v16, 4 }
  0xeb   : > { %v568_v9 = vrot.slane %v567_v61, 1  ;;  %v574_v10 = vadd.f32 %v573_v62, %v572_v52  ;;  %v596_v11 = vrot.slane %v595_v63, 2  ;;  %v602_v12 = vadd.f32 %v601_v1, %v600_v57  ;;  %v1799_v0 = vpop.permute.xlu1 %345 }
  0xec   : > { %v820_v31 = vadd.f32 %v819_v19, %v818_v6  ;;  %v826_v33 = vrot.slane %v825_v20, 4  ;;  %v844_v34 = vmul.f32 %v842_v21, %v1743_v25  ;;  %v1066_v35 = vsel %vm288_vm6, %v1064_v24, %v1065_v60  ;;  %v344_v41 = vpop.permute.xlu0 %343 }
  0xed   : > { %v569_v26 = vadd.f32 %v568_v9, %v567_v61  ;;  %v575_v27 = vrot.slane %v574_v10, 1  ;;  %v597_v29 = vadd.f32 %v596_v11, %v595_v63  ;;  %v603_v30 = vrot.slane %v602_v12, 2 }
  0xee   : > { %v821_v43 = vrot.slane %v820_v31, 2  ;;  %v827_v44 = vadd.f32 %v826_v33, %v825_v20  ;;  %v846_v47 = vcombine.high %v844_v34, %v844_v34  ;;  %v848_v48 = vsel %vm288_vm6, %v844_v34, 0.0 }
  0xef   : > { %v576_v36 = vadd.f32 %v575_v27, %v574_v10  ;;  %v577_v37 = vmul.f32 %v569_v26, %v1673_v13  ;;  %v598_v39 = vrot.slane %v597_v29, 1  ;;  %v604_v40 = vadd.f32 %v603_v30, %v602_v12  ;;  %v612_v42 = vpop.permute.xlu1 %611 }
  0xf0   : > { %v849_v53 = vrot.slane %v848_v48, 4  ;;  %v822_v54 = vadd.f32 %v821_v43, %v820_v31  ;;  %v828_v55 = vrot.slane %v827_v44, 2  ;;  %v855_v56 = vsel %vm288_vm6, %v846_v47, 0.0  ;;  %v610_v62 = vpop.permute.xlu0 %609 }
  0xf1   : > { %v578_v49 = vmul.f32 %v576_v36, %v1676_v14  ;;  %v599_v51 = vadd.f32 %v598_v39, %v597_v29  ;;  %v605_v52 = vrot.slane %v604_v40, 1  ;;  %v1067_v57 = vsel %vm410_vm15, %v1061_v16, %v1066_v35 }
  0xf2   : > { %v850_v60 = vadd.f32 %v849_v53, %v848_v48  ;;  %v856_v61 = vrot.slane %v855_v56, 4  ;;  %v823_v63 = vrot.slane %v822_v54, 1  ;;  %v829_v1 = vadd.f32 %v828_v55, %v827_v44 }
  0xf3   : > { %v606_v58 = vadd.f32 %v605_v52, %v604_v40  ;;  %v607_v59 = vmul.f32 %v599_v51, %v1760_v2  ;;  %v1069_v5 = vmul.f32 %v1067_v57, %v1743_v25  ;;  %v348_v6 = vrot.slane %v1799_v0, 4  ;;  %v867_v7 = vpop.permute.xlu1 %866 }
  0xf4   : > { %v851_v11 = vrot.slane %v850_v60, 2  ;;  %v857_v12 = vadd.f32 %v856_v61, %v855_v56  ;;  %v824_v16 = vadd.f32 %v823_v63, %v822_v54  ;;  %v830_v19 = vrot.slane %v829_v1, 1  ;;  %v865_v39 = vpop.permute.xlu0 %864 }
  0xf5   : > { %v608_v9 = vmul.f32 %v606_v58, %v1763_v3  ;;  %v1815_v10 = vsel %vm523_vm0, %v577_v37, %v607_v59  ;;  %v1071_v20 = vcombine.high %v1069_v5, %v1069_v5  ;;  %v1073_v21 = vsel %vm288_vm6, %v1069_v5, 0.0 }
  0xf6   : > { %v852_v26 = vadd.f32 %v851_v11, %v850_v60  ;;  %v858_v27 = vrot.slane %v857_v12, 2  ;;  %v1074_v0 = vrot.slane %v1073_v21, 4  ;;  %v831_v29 = vadd.f32 %v830_v19, %v829_v1 }
  0xf7   : > { %v1819_v24 = vsel %vm523_vm0, %v578_v49, %v608_v9  ;;  %v832_v30 = vmul.f32 %v824_v16, %v1682_v17  ;;  %v1080_v31 = vsel %vm288_vm6, %v1071_v20, 0.0  ;;  %v347_v33 = vrot.slane %v344_v41, 4  ;;  %v1825_v48 = vpop.permute.xlu1 %375 }
  0xf8   : > { %v853_v34 = vrot.slane %v852_v26, 1  ;;  %v859_v35 = vadd.f32 %v858_v27, %v857_v12  ;;  %v1075_v36 = vadd.f32 %v1074_v0, %v1073_v21  ;;  %v1081_v37 = vrot.slane %v1080_v31, 4 }
  0xf9   : > { %v833_v40 = vmul.f32 %v831_v29, %v1685_v18  ;;  %v349_v43 = vsel %vm288_vm6, %v347_v33, %v348_v6  ;;  %v614_v44 = vrot.slane %v612_v42, 4  ;;  %v613_v47 = vrot.slane %v610_v62, 4 }
  0xfa   : > { %v854_v49 = vadd.f32 %v853_v34, %v852_v26  ;;  %v860_v51 = vrot.slane %v859_v35, 1  ;;  %v1076_v52 = vrot.slane %v1075_v36, 2  ;;  %v1082_v53 = vadd.f32 %v1081_v37, %v1080_v31 }
  0xfb   : > { %v351_v54 = vsel %vm350_vm1, %v344_v41, %v349_v43  ;;  %v615_v55 = vsel %vm288_vm6, %v613_v47, %v614_v44  ;;  %v869_v56 = vrot.slane %v867_v7, 4  ;;  %v868_v57 = vrot.slane %v865_v39, 4  ;;  %v1841_v20 = vpop.permute.xlu1 %641 }
  0xfc   : > { %v861_v58 = vadd.f32 %v860_v51, %v859_v35  ;;  %v862_v59 = vmul.f32 0.25, %v854_v49  ;;  %v1077_v60 = vadd.f32 %v1076_v52, %v1075_v36  ;;  %v1083_v61 = vrot.slane %v1082_v53, 2 }
  0xfd   : > { %v353_v42 = vmul.f32 %v351_v54, %v1743_v25  ;;  %v617_v63 = vsel %vm616_vm2, %v610_v62, %v615_v55  ;;  %v870_v1 = vsel %vm288_vm6, %v868_v57, %v869_v56  ;;  %v378_v5 = vrot.slane %v1825_v48, 4  ;;  %v1839_v62 = vpop.permute.xlu0 %373 }
  0xfe   : > { %v863_v6 = vmul.f32 0.25, %v861_v58  ;;  %v1834_v41 = vsel %vm523_vm0, %v832_v30, %v862_v59  ;;  %v1078_v7 = vrot.slane %v1077_v60, 1  ;;  %v1084_v9 = vadd.f32 %v1083_v61, %v1082_v53 }
  0xff   : > { %v355_v11 = vcombine.high %v353_v42, %v353_v42  ;;  %v357_v12 = vsel %vm288_vm6, %v353_v42, 0.0  ;;  %v619_v16 = vmul.f32 %v617_v63, %v1743_v25  ;;  %v872_v19 = vsel %vm871_vm3, %v865_v39, %v870_v1  ;;  %v1856_v58 = vpop.permute.xlu1 %896 }
 0x100   : > { %v1844_v21 = vsel %vm523_vm0, %v833_v40, %v863_v6  ;;  %v1079_v26 = vadd.f32 %v1078_v7, %v1077_v60  ;;  %v1085_v27 = vrot.slane %v1084_v9, 1  ;;  %v358_v0 = vrot.slane %v357_v12, 4 }
 0x101   : > { %v364_v29 = vsel %vm288_vm6, %v355_v11, 0.0  ;;  %v621_v30 = vcombine.high %v619_v16, %v619_v16  ;;  %v623_v31 = vsel %vm288_vm6, %v619_v16, 0.0  ;;  %v874_v33 = vmul.f32 %v872_v19, %v1743_v25  ;;  %v640_v57 = vpop.permute.xlu0 %639 }
 0x102   : > { %v1086_v34 = vadd.f32 %v1085_v27, %v1084_v9  ;;  %v1087_v35 = vmul.f32 %v1079_v26, %v1760_v2  ;;  %v359_v36 = vadd.f32 %v358_v0, %v357_v12  ;;  %v365_v37 = vrot.slane %v364_v29, 4 }
 0x103   : > { %v624_v39 = vrot.slane %v623_v31, 4  ;;  %v630_v40 = vsel %vm288_vm6, %v621_v30, 0.0  ;;  %v876_v43 = vcombine.high %v874_v33, %v874_v33  ;;  %v878_v44 = vsel %vm288_vm6, %v874_v33, 0.0 }
 0x104   : > { %v1088_v47 = vmul.f32 %v1086_v34, %v1763_v3  ;;  %v1089_v49 = vsel %vm523_vm0, %v1087_v35, 0.0  ;;  %v360_v51 = vrot.slane %v359_v36, 2  ;;  %v366_v52 = vadd.f32 %v365_v37, %v364_v29 }
 0x105   : > { %v1091_v53 = vsel %vm526_vm4, %v1089_v49, 0.0  ;;  %v625_v54 = vadd.f32 %v624_v39, %v623_v31  ;;  %v631_v55 = vrot.slane %v630_v40, 4  ;;  %v879_v56 = vrot.slane %v878_v44, 4  ;;  %v895_v39 = vpop.permute.xlu0 %894 }
 0x106   : > { %v1090_v59 = vsel %vm523_vm0, %v1088_v47, 0.0  ;;  %v1093_v60 = vsel %vm529_vm5, %v1091_v53, 0.0  ;;  %v361_v61 = vadd.f32 %v360_v51, %v359_v36  ;;  %v367_v42 = vrot.slane %v366_v52, 2 }
 0x107   : > { %v1092_v63 = vsel %vm526_vm4, %v1090_v59, 0.0  ;;  %v1095_v1 = vsel %vm288_vm6, %v1093_v60, 0.0  ;;  %v626_v6 = vrot.slane %v625_v54, 2  ;;  %v632_v7 = vadd.f32 %v631_v55, %v630_v40  ;;  %v1874_v40 = vpop.permute.xlu1 %405 }
 0x108   : > { %vm646_vm13 = vcmask 15360   ;;  %v1094_v9 = vsel %vm529_vm5, %v1092_v63, 0.0  ;;  %v1097_v11 = vsel %vm534_vm9, %v1095_v1, 0.0  ;;  %v362_v12 = vrot.slane %v361_v61, 1 }
 0x109   : > { %v368_v16 = vadd.f32 %v367_v42, %v366_v52  ;;  %v1096_v19 = vsel %vm288_vm6, %v1094_v9, 0.0  ;;  %v1099_v26 = vsel %vm537_vm10, %v1097_v11, 0.0  ;;  %v627_v27 = vadd.f32 %v626_v6, %v625_v54 }
 0x10a   : > { %v633_v0 = vrot.slane %v632_v7, 2  ;;  %vm901_vm14 = vcmask 752640   ;;  %v1098_v29 = vsel %vm534_vm9, %v1096_v19, 0.0  ;;  %v1101_v30 = vsel %vm540_vm11, %v1099_v26, 0.0  ;;  %v404_v26 = vpop.permute.xlu0 %403 }
 0x10b   : > { %v363_v31 = vadd.f32 %v362_v12, %v361_v61  ;;  %v369_v33 = vrot.slane %v368_v16, 1  ;;  %v1100_v34 = vsel %vm537_vm10, %v1098_v29, 0.0  ;;  %1103 = vst [vmem:[%s1871_s28 + $0x30] sm:$0xff] %v1101_v30  ;;  %v628_v35 = vrot.slane %v627_v27, 1 }
 0x10c   : > { %v634_v36 = vadd.f32 %v633_v0, %v632_v7  ;;  %v880_v37 = vadd.f32 %v879_v56, %v878_v44  ;;  %v1102_v47 = vsel %vm540_vm11, %v1100_v34, 0.0  ;;  %v885_v52 = vsel %vm288_vm6, %v876_v43, 0.0 }
 0x10d   : > { %v370_v49 = vadd.f32 %v369_v33, %v368_v16  ;;  %v1877_v51 = vmul.f32 0.25, %v363_v31  ;;  %1104 = vst [vmem:[%s1871_s28 + $0x38] sm:$0xff] %v1102_v47  ;;  %v629_v53 = vadd.f32 %v628_v35, %v627_v27  ;;  %v886_v59 = vrot.slane %v885_v52, 4  ;;  %v1896_v27 = vpop.permute.xlu1 %926 }
 0x10e   : > { %v635_v54 = vrot.slane %v634_v36, 1  ;;  %v881_v55 = vrot.slane %v880_v37, 2  ;;  %v377_v61 = vrot.slane %v1839_v62, 4  ;;  %v644_v44 = vrot.slane %v1841_v20, 4 }
 0x10f   : > { %v1881_v60 = vmul.f32 0.25, %v370_v49  ;;  %v643_v56 = vrot.slane %v640_v57, 4  ;;  %v637_v63 = vmul.f32 %v629_v53, %v1694_v22  ;;  %v887_v6 = vadd.f32 %v886_v59, %v885_v52 }
 0x110   : > { %v636_v42 = vadd.f32 %v635_v54, %v634_v36  ;;  %v882_v1 = vadd.f32 %v881_v55, %v880_v37  ;;  %v379_v43 = vsel %vm288_vm6, %v377_v61, %v378_v5  ;;  %v899_v9 = vrot.slane %v1856_v58, 4 }
 0x111   : > { %v645_v7 = vsel %vm288_vm6, %v643_v56, %v644_v44  ;;  %v898_v11 = vrot.slane %v895_v39, 4  ;;  %v1894_v20 = vsel %vm526_vm4, %v1815_v10, %v637_v63  ;;  %v888_v19 = vrot.slane %v887_v6, 2 }
 0x112   : > { %v638_v12 = vmul.f32 %v636_v42, %v1698_v23  ;;  %v883_v16 = vrot.slane %v882_v1, 1  ;;  %v381_v48 = vsel %vm380_vm12, %v1839_v62, %v379_v43  ;;  %v647_v5 = vsel %vm646_vm13, %v640_v57, %v645_v7 }
 0x113   : > { %v900_v0 = vsel %vm288_vm6, %v898_v11, %v899_v9  ;;  %v408_v58 = vrot.slane %v1874_v40, 4  ;;  %v889_v30 = vadd.f32 %v888_v19, %v887_v6  ;;  %v383_v31 = vmul.f32 %v381_v48, %v1743_v25 }
 0x114   : > { %v1905_v29 = vsel %vm526_vm4, %v1819_v24, %v638_v12  ;;  %v884_v10 = vadd.f32 %v883_v16, %v882_v1  ;;  %v649_v33 = vmul.f32 %v647_v5, %v1743_v25  ;;  %v902_v34 = vsel %vm901_vm14, %v895_v39, %v900_v0 }
 0x115   : > { %v407_v35 = vrot.slane %v404_v26, 4  ;;  %v929_v62 = vrot.slane %v1896_v27, 4  ;;  %v890_v57 = vrot.slane %v889_v30, 1  ;;  %v385_v37 = vcombine.high %v383_v31, %v383_v31 }
 0x116   : > { %v892_v36 = vmul.f32 %v884_v10, %v1673_v13  ;;  %v387_v40 = vsel %vm288_vm6, %v383_v31, 0.0  ;;  %v651_v24 = vcombine.high %v649_v33, %v649_v33  ;;  %v653_v49 = vsel %vm288_vm6, %v649_v33, 0.0 }
 0x117   : > { %v388_v47 = vrot.slane %v387_v40, 4  ;;  %v904_v52 = vmul.f32 %v902_v34, %v1743_v25  ;;  %v891_v53 = vadd.f32 %v890_v57, %v889_v30  ;;  %v394_v39 = vsel %vm288_vm6, %v385_v37, 0.0 }
 0x118   : > { %v1917_v54 = vsel %vm526_vm4, %v1834_v41, %v892_v36  ;;  %v654_v55 = vrot.slane %v653_v49, 4  ;;  %v395_v61 = vrot.slane %v394_v39, 4  ;;  %v660_v44 = vsel %vm288_vm6, %v651_v24, 0.0 }
 0x119   : > { %v389_v59 = vadd.f32 %v388_v47, %v387_v40  ;;  %v906_v56 = vcombine.high %v904_v52, %v904_v52  ;;  %v893_v42 = vmul.f32 %v891_v53, %v1676_v14  ;;  %v661_v1 = vrot.slane %v660_v44, 4  ;;  %v436_v53 = vpop.permute.xlu1 %435 }
 0x11a   : > { %v655_v63 = vadd.f32 %v654_v55, %v653_v49  ;;  %v908_v6 = vsel %vm288_vm6, %v904_v52, 0.0  ;;  %v396_v7 = vadd.f32 %v395_v61, %v394_v39  ;;  %v409_v10 = vsel %vm288_vm6, %v407_v35, %v408_v58 }
 0x11b   : > { %v390_v43 = vrot.slane %v389_v59, 2  ;;  %v909_v9 = vrot.slane %v908_v6, 4  ;;  %v915_v41 = vsel %vm288_vm6, %v906_v56, 0.0  ;;  %v1926_v11 = vsel %vm526_vm4, %v1844_v21, %v893_v42  ;;  %v925_v21 = vpop.permute.xlu0 %924 }
 0x11c   : > { %v656_v12 = vrot.slane %v655_v63, 2  ;;  %v662_v16 = vadd.f32 %v661_v1, %v660_v44  ;;  %v916_v19 = vrot.slane %v915_v41, 4  ;;  %v397_v5 = vrot.slane %v396_v7, 2 }
 0x11d   : > { %v391_v48 = vadd.f32 %v390_v43, %v389_v59  ;;  %v910_v0 = vadd.f32 %v909_v9, %v908_v6  ;;  %v411_v34 = vsel %vm410_vm15, %v404_v26, %v409_v10  ;;  %v303_v52 = vadd.f32 %v302_v8, %v1786_v45  ;;  %v697_v10 = vpop.permute.xlu1 %696 }
 0x11e   : > { %v657_v30 = vadd.f32 %v656_v12, %v655_v63  ;;  %v663_v31 = vrot.slane %v662_v16, 2  ;;  %v917_v33 = vadd.f32 %v916_v19, %v915_v41  ;;  %v398_v36 = vadd.f32 %v397_v5, %v396_v7 }
 0x11f   : > { %v392_v57 = vrot.slane %v391_v48, 1  ;;  %v911_v37 = vrot.slane %v910_v0, 2  ;;  %v413_v40 = vmul.f32 %v411_v34, %v1743_v25  ;;  %vm440_vm15 = vcmask 293888  }
 0x120   : > { %v658_v47 = vrot.slane %v657_v30, 1  ;;  %v664_v24 = vadd.f32 %v663_v31, %v662_v16  ;;  %v918_v49 = vrot.slane %v917_v33, 2  ;;  %v399_v35 = vrot.slane %v398_v36, 1  ;;  %v434_v16 = vpop.permute.xlu0 %433 }
 0x121   : > { %v393_v58 = vadd.f32 %v392_v57, %v391_v48  ;;  %v912_v39 = vadd.f32 %v911_v37, %v910_v0  ;;  %v415_v55 = vcombine.high %v413_v40, %v413_v40  ;;  %v417_v44 = vsel %vm288_vm6, %v413_v40, 0.0  ;;  %v1977_v27 = vpop.permute.xlu1 %955 }
 0x122   : > { %v659_v59 = vadd.f32 %v658_v47, %v657_v30  ;;  %v665_v26 = vrot.slane %v664_v24, 1  ;;  %v919_v61 = vadd.f32 %v918_v49, %v917_v33  ;;  %v400_v56 = vadd.f32 %v399_v35, %v398_v36 }
 0x123   : > { %v1936_v42 = vmul.f32 %v393_v58, %v1673_v13  ;;  %v913_v63 = vrot.slane %v912_v39, 1  ;;  %v418_v1 = vrot.slane %v417_v44, 4  ;;  %v424_v43 = vsel %vm288_vm6, %v415_v55, 0.0 }
 0x124   : > { %v666_v6 = vadd.f32 %v665_v26, %v664_v24  ;;  %v667_v45 = vmul.f32 %v659_v59, %v1682_v17  ;;  %v920_v8 = vrot.slane %v919_v61, 1  ;;  %v1941_v7 = vmul.f32 %v400_v56, %v1676_v14 }
 0x125   : > { %v914_v9 = vadd.f32 %v913_v63, %v912_v39  ;;  %v419_v41 = vadd.f32 %v418_v1, %v417_v44  ;;  %v425_v12 = vrot.slane %v424_v43, 4  ;;  %v308_v0 = vadd.f32 %v307_v46, %v1782_v38 }
 0x126   : > { %v668_v19 = vmul.f32 %v666_v6, %v1685_v18  ;;  %v788_v48 = vsel %vm529_vm5, %v1894_v20, %v667_v45  ;;  %v921_v5 = vadd.f32 %v920_v8, %v919_v61  ;;  %v1951_v34 = vmul.f32 %v303_v52, %v1694_v22 }
 0x127   : > { %v922_v30 = vmul.f32 %v914_v9, %v1760_v2  ;;  %v420_v31 = vrot.slane %v419_v41, 2  ;;  %v426_v33 = vadd.f32 %v425_v12, %v424_v43  ;;  %vm701_vm2 = vcmask 1031168  }
 0x128   : > { %v789_v57 = vsel %vm529_vm5, %v1905_v29, %v668_v19  ;;  %v923_v36 = vmul.f32 %v921_v5, %v1763_v3  ;;  %v309_v20 = vrot.slane %v308_v0, 1  ;;  %v928_v37 = vrot.slane %v925_v21, 4 }
 0x129   : > { %v1958_v40 = vsel %vm529_vm5, %v1917_v54, %v922_v30  ;;  %v421_v38 = vadd.f32 %v420_v31, %v419_v41  ;;  %v427_v46 = vrot.slane %v426_v33, 2  ;;  %v438_v47 = vrot.slane %v436_v53, 4  ;;  %v695_v54 = vpop.permute.xlu0 %694 }
 0x12a   : > { %v1962_v24 = vsel %vm529_vm5, %v1926_v11, %v923_v36  ;;  %v310_v49 = vadd.f32 %v309_v20, %v308_v0  ;;  %v930_v29 = vsel %vm288_vm6, %v928_v37, %v929_v62  ;;  %v437_v52 = vrot.slane %v434_v16, 4 }
 0x12b   : > { %v422_v58 = vrot.slane %v421_v38, 1  ;;  %v428_v35 = vadd.f32 %v427_v46, %v426_v33  ;;  %v931_v39 = vsel %vm290_vm7, %v925_v21, %v930_v29  ;;  %v699_v55 = vrot.slane %v697_v10, 4 }
 0x12c   : > { %v1969_v59 = vmul.f32 %v310_v49, %v1698_v23  ;;  %v933_v53 = vmul.f32 %v931_v39, %v1743_v25  ;;  %v439_v11 = vsel %vm288_vm6, %v437_v52, %v438_v47  ;;  %v1975_v26 = vsel %vm288_vm6, %v788_v48, %v1765_v4 }
 0x12d   : > { %v423_v62 = vadd.f32 %v422_v58, %v421_v38  ;;  %v429_v61 = vrot.slane %v428_v35, 1  ;;  %v441_v44 = vsel %vm440_vm15, %v434_v16, %v439_v11  ;;  %v1982_v21 = vsel %vm288_vm6, %v789_v57, %v1770_v15  ;;  %v1996_v0 = vpop.permute.xlu0 %953 }
 0x12e   : > { %v935_v56 = vcombine.high %v933_v53, %v933_v53  ;;  %v937_v63 = vsel %vm288_vm6, %v933_v53, 0.0  ;;  %v443_v1 = vmul.f32 %v441_v44, %v1743_v25  ;;  %v698_v6 = vrot.slane %v695_v54, 4 }
 0x12f   : > { %v430_v45 = vadd.f32 %v429_v61, %v428_v35  ;;  %v1987_v4 = vmul.f32 %v423_v62, %v1760_v2  ;;  %v938_v8 = vrot.slane %v937_v63, 4  ;;  %v958_v43 = vrot.slane %v1977_v27, 4 }
 0x130   : > { %v944_v9 = vsel %vm288_vm6, %v935_v56, 0.0  ;;  %v445_v41 = vcombine.high %v443_v1, %v443_v1  ;;  %v447_v12 = vsel %vm288_vm6, %v443_v1, 0.0  ;;  %v700_v15 = vsel %vm288_vm6, %v698_v6, %v699_v55 }
 0x131   : > { %v1994_v16 = vmul.f32 %v430_v45, %v1763_v3  ;;  %v939_v19 = vadd.f32 %v938_v8, %v937_v63  ;;  %v945_v48 = vrot.slane %v944_v9, 4  ;;  %v448_v5 = vrot.slane %v447_v12, 4  ;;  %v466_v63 = vpop.permute.xlu1 %465  ;;  %v464_v1 = vpop.permute.xlu0 %463 }
 0x132   : > { %v454_v10 = vsel %vm288_vm6, %v445_v41, 0.0  ;;  %v702_v30 = vsel %vm701_vm2, %v695_v54, %v700_v15  ;;  %v330_v31 = vrot.slane %v1791_v50, 2  ;;  %v336_v33 = vadd.f32 %v335_v32, %v1776_v28 }
 0x133   : > { %v940_v57 = vrot.slane %v939_v19, 2  ;;  %v946_v36 = vadd.f32 %v945_v48, %v944_v9  ;;  %v449_v20 = vadd.f32 %v448_v5, %v447_v12  ;;  %v455_v37 = vrot.slane %v454_v10, 4 }
 0x134   : > { %v704_v38 = vmul.f32 %v702_v30, %v1743_v25  ;;  %v331_v46 = vadd.f32 %v330_v31, %v1791_v50  ;;  %v337_v47 = vrot.slane %v336_v33, 2  ;;  %v957_v49 = vrot.slane %v1996_v0, 4 }
 0x135   : > { %v941_v29 = vadd.f32 %v940_v57, %v939_v19  ;;  %v947_v52 = vrot.slane %v946_v36, 2  ;;  %v450_v58 = vrot.slane %v449_v20, 2  ;;  %v456_v35 = vadd.f32 %v455_v37, %v454_v10 }
 0x136   : > { %v706_v39 = vcombine.high %v704_v38, %v704_v38  ;;  %v708_v55 = vsel %vm288_vm6, %v704_v38, 0.0  ;;  %v332_v54 = vrot.slane %v331_v46, 1  ;;  %v338_v28 = vadd.f32 %v337_v47, %v336_v33 }
 0x137   : > { %v942_v32 = vrot.slane %v941_v29, 1  ;;  %v948_v53 = vadd.f32 %v947_v52, %v946_v36  ;;  %v451_v11 = vadd.f32 %v450_v58, %v449_v20  ;;  %v457_v62 = vrot.slane %v456_v35, 2 }
 0x138   : > { %v709_v61 = vrot.slane %v708_v55, 4  ;;  %v715_v44 = vsel %vm288_vm6, %v706_v39, 0.0  ;;  %v333_v50 = vadd.f32 %v332_v54, %v331_v46  ;;  %v339_v56 = vrot.slane %v338_v28, 1 }
 0x139   : > { %v943_v6 = vadd.f32 %v942_v32, %v941_v29  ;;  %v949_v45 = vrot.slane %v948_v53, 1  ;;  %v452_v8 = vrot.slane %v451_v11, 1  ;;  %v458_v9 = vadd.f32 %v457_v62, %v456_v35  ;;  %v727_v35 = vpop.permute.xlu1 %726 }
 0x13a   : > { %v710_v41 = vadd.f32 %v709_v61, %v708_v55  ;;  %v716_v12 = vrot.slane %v715_v44, 4  ;;  %v340_v15 = vadd.f32 %v339_v56, %v338_v28  ;;  %v341_v19 = vmul.f32 %v333_v50, %v1682_v17 }
 0x13b   : > { %vm470_vm7 = vcmask 277504   ;;  %v950_v48 = vadd.f32 %v949_v45, %v948_v53  ;;  %v951_v5 = vmul.f32 %v943_v6, %v1694_v22  ;;  %v453_v10 = vadd.f32 %v452_v8, %v451_v11 }
 0x13c   : > { %v459_v30 = vrot.slane %v458_v9, 1  ;;  %v711_v31 = vrot.slane %v710_v41, 2  ;;  %v717_v33 = vadd.f32 %v716_v12, %v715_v44  ;;  %v342_v57 = vmul.f32 %v340_v15, %v1685_v18 }
 0x13d   : > { %v524_v36 = vsel %vm523_vm0, %v1951_v34, %v341_v19  ;;  %v952_v20 = vmul.f32 %v950_v48, %v1698_v23  ;;  %v2017_v37 = vsel %vm288_vm6, %v1958_v40, %v951_v5  ;;  %v461_v46 = vmul.f32 %v453_v10, %v1694_v22  ;;  %v725_v34 = vpop.permute.xlu0 %724  ;;  %v2062_v19 = vld [vmem:[%s1634_s30] sm:$0xff]  ;;  %s1235_s30 = sshll.u32 %s1503_s13, 10 }
 0x13e   : > { %v460_v38 = vadd.f32 %v459_v30, %v458_v9  ;;  %vm731_vm3 = vcmask 1014784   ;;  %v712_v47 = vadd.f32 %v711_v31, %v710_v41  ;;  %v718_v29 = vrot.slane %v717_v33, 2  ;;  %s2142_s24 = scalar_lea.hbm %s2195_s2, %s1235_s30 }
 0x13f   : > { %v525_v52 = vsel %vm523_vm0, %v1969_v59, %v342_v57  ;;  %v527_v58 = vsel %vm526_vm4, %v524_v36, %v1877_v51  ;;  %v2026_v39 = vsel %vm288_vm6, %v1962_v24, %v952_v20  ;;  %v959_v54 = vsel %vm288_vm6, %v957_v49, %v958_v43 }
 0x140   : > { %v462_v40 = vmul.f32 %v460_v38, %v1698_v23  ;;  %v528_v55 = vsel %vm526_vm4, %v525_v52, %v1881_v60  ;;  %v713_v28 = vrot.slane %v712_v47, 1  ;;  %v719_v59 = vadd.f32 %v718_v29, %v717_v33 }
 0x141   : > { %v960_v51 = vsel %vm320_vm8, %v1996_v0, %v959_v54  ;;  %v468_v32 = vrot.slane %v466_v63, 4  ;;  %v530_v24 = vsel %vm529_vm5, %v527_v58, %v1936_v42  ;;  %v531_v11 = vsel %vm529_vm5, %v528_v55, %v1941_v7  ;;  %v983_v63 = vpop.permute.xlu0 %982 }
 0x142   : > { %v962_v53 = vmul.f32 %v960_v51, %v1743_v25  ;;  %v467_v62 = vrot.slane %v464_v1, 4  ;;  %v714_v60 = vadd.f32 %v713_v28, %v712_v47  ;;  %v720_v61 = vrot.slane %v719_v59, 1 }
 0x143   : > { %v532_v27 = vsel %vm288_vm6, %v530_v24, %v1987_v4  ;;  %v533_v43 = vsel %vm288_vm6, %v531_v11, %v1994_v16  ;;  %v985_v4 = vpop.permute.xlu1 %984  ;;  %v729_v45 = vrot.slane %v727_v35, 4  ;;  %v728_v8 = vrot.slane %v725_v34, 4 }
 0x144   : > { %v964_v49 = vcombine.high %v962_v53, %v962_v53  ;;  %v966_v0 = vsel %vm288_vm6, %v962_v53, 0.0  ;;  %v2047_v25 = vsel %vm534_vm9, %v532_v27, %v461_v46  ;;  %v2050_v42 = vsel %vm534_vm9, %v533_v43, %v462_v40 }
 0x145   : > { %v721_v7 = vadd.f32 %v720_v61, %v719_v59  ;;  %v722_v44 = vmul.f32 %v714_v60, %v1673_v13  ;;  %v967_v50 = vrot.slane %v966_v0, 4  ;;  %v469_v56 = vsel %vm288_vm6, %v467_v62, %v468_v32  ;;  %v494_v32 = vpop.permute.xlu0 %493 }
 0x146   : > { %v973_v16 = vsel %vm288_vm6, %v964_v49, 0.0  ;;  %v471_v6 = vsel %vm470_vm7, %v464_v1, %v469_v56  ;;  %v730_v5 = vsel %vm288_vm6, %v728_v8, %v729_v45  ;;  %v987_v10 = vrot.slane %v985_v4, 4 }
 0x147   : > { %v723_v9 = vmul.f32 %v721_v7, %v1676_v14  ;;  %v2059_v41 = vsel %vm534_vm9, %v1975_v26, %v722_v44  ;;  %v968_v12 = vadd.f32 %v967_v50, %v966_v0  ;;  %v974_v15 = vrot.slane %v973_v16, 4  ;;  %v496_v40 = vpop.permute.xlu1 %495 }
 0x148   : > { %v473_v48 = vmul.f32 %v2062_v19, %v471_v6  ;;  %v986_v30 = vrot.slane %v983_v63, 4  ;;  %v732_v57 = vsel %vm731_vm3, %v725_v34, %v730_v5  ;;  %vm500_vm8 = vcmask 261120  }
 0x149   : > { %v2068_v1 = vsel %vm534_vm9, %v1982_v21, %v723_v9  ;;  %v969_v31 = vrot.slane %v968_v12, 2  ;;  %v975_v33 = vadd.f32 %v974_v15, %v973_v16  ;;  %v734_v20 = vmul.f32 %v2062_v19, %v732_v57  ;;  %v755_v8 = vpop.permute.xlu0 %754 }
 0x14a   : > { %v475_v26 = vcombine.high %v473_v48, %v473_v48  ;;  %v477_v36 = vsel %vm288_vm6, %v473_v48, 0.0  ;;  %v988_v38 = vsel %vm288_vm6, %v986_v30, %v987_v10  ;;  %v498_v48 = vrot.slane %v496_v40, 4 }
 0x14b   : > { %v970_v46 = vadd.f32 %v969_v31, %v968_v12  ;;  %v976_v47 = vrot.slane %v975_v33, 2  ;;  %v478_v29 = vrot.slane %v477_v36, 4  ;;  %v989_v52 = vsel %vm350_vm1, %v983_v63, %v988_v38  ;;  %v757_v50 = vpop.permute.xlu1 %756 }
 0x14c   : > { %v484_v58 = vsel %vm288_vm6, %v475_v26, 0.0  ;;  %v736_v21 = vcombine.high %v734_v20, %v734_v20  ;;  %v991_v35 = vmul.f32 %v2062_v19, %v989_v52  ;;  %v738_v59 = vsel %vm288_vm6, %v734_v20, 0.0 }
 0x14d   : > { %v971_v55 = vrot.slane %v970_v46, 1  ;;  %v977_v34 = vadd.f32 %v976_v47, %v975_v33  ;;  %v479_v54 = vadd.f32 %v478_v29, %v477_v36  ;;  %v485_v28 = vrot.slane %v484_v58, 4  ;;  %v1012_v29 = vpop.permute.xlu0 %1011 }
 0x14e   : > { %v993_v51 = vcombine.high %v991_v35, %v991_v35  ;;  %v745_v60 = vsel %vm288_vm6, %v736_v21, 0.0  ;;  %v995_v61 = vsel %vm288_vm6, %v991_v35, 0.0  ;;  %v739_v7 = vrot.slane %v738_v59, 4 }
 0x14f   : > { %v972_v53 = vadd.f32 %v971_v55, %v970_v46  ;;  %v978_v24 = vrot.slane %v977_v34, 1  ;;  %v480_v11 = vrot.slane %v479_v54, 2  ;;  %v486_v62 = vadd.f32 %v485_v28, %v484_v58  ;;  %v1014_v26 = vpop.permute.xlu1 %1013 }
 0x150   : > { %v1002_v44 = vsel %vm288_vm6, %v993_v51, 0.0  ;;  %v746_v6 = vrot.slane %v745_v60, 4  ;;  %v996_v45 = vrot.slane %v995_v61, 4  ;;  %v740_v5 = vadd.f32 %v739_v7, %v738_v59 }
 0x151   : > { %v979_v27 = vadd.f32 %v978_v24, %v977_v34  ;;  %v980_v43 = vmul.f32 %v972_v53, %v1682_v17  ;;  %v481_v49 = vadd.f32 %v480_v11, %v479_v54  ;;  %v487_v0 = vrot.slane %v486_v62, 2 }
 0x152   : > { %v1003_v10 = vrot.slane %v1002_v44, 4  ;;  %v497_v33 = vrot.slane %v494_v32, 4  ;;  %v997_v57 = vadd.f32 %v996_v45, %v995_v61  ;;  %v759_v38 = vrot.slane %v757_v50, 4 }
 0x153   : > { %v981_v56 = vmul.f32 %v979_v27, %v1685_v18  ;;  %v2085_v4 = vsel %vm534_vm9, %v2017_v37, %v980_v43  ;;  %v482_v63 = vrot.slane %v481_v49, 1  ;;  %v488_v16 = vadd.f32 %v487_v0, %v486_v62 }
 0x154   : > { %v747_v37 = vadd.f32 %v746_v6, %v745_v60  ;;  %v741_v46 = vrot.slane %v740_v5, 2  ;;  %v1004_v47 = vadd.f32 %v1003_v10, %v1002_v44  ;;  %vm761_vm0 = vcmask 818176  }
 0x155   : > { %v2089_v9 = vsel %vm534_vm9, %v2026_v39, %v981_v56  ;;  %v483_v12 = vadd.f32 %v482_v63, %v481_v49  ;;  %v489_v15 = vrot.slane %v488_v16, 1  ;;  %v499_v39 = vsel %vm288_vm6, %v497_v33, %v498_v48 }
 0x156   : > { %v501_v52 = vsel %vm500_vm8, %v494_v32, %v499_v39  ;;  %v758_v58 = vrot.slane %v755_v8, 4  ;;  %v1016_v21 = vrot.slane %v1014_v26, 4  ;;  %v748_v35 = vrot.slane %v747_v37, 2 }
 0x157   : > { %v490_v30 = vadd.f32 %v489_v15, %v488_v16  ;;  %v491_v31 = vmul.f32 %v483_v12, %v1682_v17  ;;  %v503_v40 = vmul.f32 %v2062_v19, %v501_v52  ;;  %v1015_v55 = vrot.slane %v1012_v29, 4 }
 0x158   : > { %v742_v34 = vadd.f32 %v741_v46, %v740_v5  ;;  %v1005_v54 = vrot.slane %v1004_v47, 2  ;;  %v749_v32 = vadd.f32 %v748_v35, %v747_v37 }
 0x159   : > { %v492_v36 = vmul.f32 %v490_v30, %v1685_v18  ;;  %v2095_v20 = vsel %vm537_vm10, %v2047_v25, %v491_v31  ;;  %v998_v18 = vrot.slane %v997_v57, 2  ;;  %v760_v25 = vsel %vm288_vm6, %v758_v58, %v759_v38 }
 0x15a   : > { %v762_v28 = vsel %vm761_vm0, %v755_v8, %v760_v25  ;;  %v505_v59 = vcombine.high %v503_v40, %v503_v40  ;;  %v507_v51 = vsel %vm288_vm6, %v503_v40, 0.0  ;;  %v743_v49 = vrot.slane %v742_v34, 1 }
 0x15b   : > { %v2100_v17 = vsel %vm537_vm10, %v2050_v42, %v492_v36  ;;  %v764_v53 = vmul.f32 %v2062_v19, %v762_v28  ;;  %v1017_v42 = vsel %vm288_vm6, %v1015_v55, %v1016_v21  ;;  %v999_v24 = vadd.f32 %v998_v18, %v997_v57 }
 0x15c   : > { %v508_v11 = vrot.slane %v507_v51, 4  ;;  %v1018_v62 = vsel %vm380_vm12, %v1012_v29, %v1017_v42  ;;  %v514_v60 = vsel %vm288_vm6, %v505_v59, 0.0  ;;  %v1006_v50 = vadd.f32 %v1005_v54, %v1004_v47 }
 0x15d   : > { %v766_v61 = vcombine.high %v764_v53, %v764_v53  ;;  %v768_v27 = vsel %vm288_vm6, %v764_v53, 0.0  ;;  %v1020_v43 = vmul.f32 %v2062_v19, %v1018_v62  ;;  %v515_v7 = vrot.slane %v514_v60, 4 }
 0x15e   : > { %v509_v0 = vadd.f32 %v508_v11, %v507_v51  ;;  %v769_v44 = vrot.slane %v768_v27, 4  ;;  %v750_v15 = vrot.slane %v749_v32, 1  ;;  %v1000_v48 = vrot.slane %v999_v24, 1 }
 0x15f   : > { %v775_v56 = vsel %vm288_vm6, %v766_v61, 0.0  ;;  %v1022_v63 = vcombine.high %v1020_v43, %v1020_v43  ;;  %v1024_v16 = vsel %vm288_vm6, %v1020_v43, 0.0  ;;  %v516_v45 = vadd.f32 %v515_v7, %v514_v60 }
 0x160   : > { %v510_v6 = vrot.slane %v509_v0, 2  ;;  %v770_v8 = vadd.f32 %v769_v44, %v768_v27  ;;  %v776_v12 = vrot.slane %v775_v56, 4  ;;  %v1025_v5 = vrot.slane %v1024_v16, 4 }
 0x161   : > { %v1031_v10 = vsel %vm288_vm6, %v1022_v63, 0.0  ;;  %v517_v30 = vrot.slane %v516_v45, 2  ;;  %v744_v37 = vadd.f32 %v743_v49, %v742_v34  ;;  %v1007_v57 = vrot.slane %v1006_v50, 1 }
 0x162   : > { %v511_v19 = vadd.f32 %v510_v6, %v509_v0  ;;  %v771_v31 = vrot.slane %v770_v8, 2  ;;  %v777_v33 = vadd.f32 %v776_v12, %v775_v56  ;;  %v1026_v26 = vadd.f32 %v1025_v5, %v1024_v16 }
 0x163   : > { %v1032_v36 = vrot.slane %v1031_v10, 4  ;;  %v518_v38 = vadd.f32 %v517_v30, %v516_v45  ;;  %v751_v29 = vadd.f32 %v750_v15, %v749_v32  ;;  %v1001_v52 = vadd.f32 %v1000_v48, %v999_v24 }
 0x164   : > { %v512_v39 = vrot.slane %v511_v19, 1  ;;  %v772_v46 = vadd.f32 %v771_v31, %v770_v8  ;;  %v778_v47 = vrot.slane %v777_v33, 2  ;;  %v1027_v58 = vrot.slane %v1026_v26, 2 }
 0x165   : > { %v1033_v21 = vadd.f32 %v1032_v36, %v1031_v10  ;;  %v519_v18 = vrot.slane %v518_v38, 1  ;;  %v752_v55 = vmul.f32 %v744_v37, %v1760_v2  ;;  %v1008_v54 = vadd.f32 %v1007_v57, %v1006_v50 }
 0x166   : > { %v513_v35 = vadd.f32 %v512_v39, %v511_v19  ;;  %v773_v40 = vrot.slane %v772_v46, 1  ;;  %v779_v25 = vadd.f32 %v778_v47, %v777_v33  ;;  %v1028_v34 = vadd.f32 %v1027_v58, %v1026_v26 }
 0x167   : > { %v1034_v28 = vrot.slane %v1033_v21, 2  ;;  %v520_v59 = vadd.f32 %v519_v18, %v518_v38  ;;  %v753_v11 = vmul.f32 %v751_v29, %v1763_v3  ;;  %v1009_v32 = vmul.f32 0.25, %v1001_v52 }
 0x168   : > { %v521_v51 = vmul.f32 0.25, %v513_v35  ;;  %v774_v53 = vadd.f32 %v773_v40, %v772_v46  ;;  %v780_v42 = vrot.slane %v779_v25, 1  ;;  %v1029_v24 = vrot.slane %v1028_v34, 1 }
 0x169   : > { %v1035_v62 = vadd.f32 %v1034_v28, %v1033_v21  ;;  %v522_v60 = vmul.f32 0.25, %v520_v59  ;;  %v794_v43 = vsel %vm537_vm10, %v2059_v41, %v752_v55  ;;  %v1010_v0 = vmul.f32 0.25, %v1008_v54 }
 0x16a   : > { %v541_v2 = vsel %vm540_vm11, %v2095_v20, %v521_v51  ;;  %v781_v61 = vadd.f32 %v780_v42, %v779_v25  ;;  %v782_v27 = vmul.f32 %v774_v53, %v1694_v22  ;;  %v1030_v3 = vadd.f32 %v1029_v24, %v1028_v34 }
 0x16b   : > { %543 = vst [vmem:[%s1871_s28] sm:$0xff] %v541_v2  ;;  %v1036_v49 = vrot.slane %v1035_v62, 1  ;;  %v542_v7 = vsel %vm540_vm11, %v2100_v17, %v522_v60  ;;  %v795_v22 = vsel %vm537_vm10, %v2068_v1, %v753_v11  ;;  %v1050_v17 = vsel %vm537_vm10, %v2085_v4, %v1009_v32 }
 0x16c   : > { %v783_v44 = vmul.f32 %v781_v61, %v1698_v23  ;;  %v796_v50 = vsel %vm540_vm11, %v794_v43, %v782_v27  ;;  %544 = vst [vmem:[%s1871_s28 + $0x8] sm:$0xff] %v542_v7  ;;  %v1038_v20 = vmul.f32 %v1030_v3, %v1673_v13  ;;  %v1051_v13 = vsel %vm537_vm10, %v2089_v9, %v1010_v0 }
 0x16d   : > { %798 = vst [vmem:[%s1871_s28 + $0x10] sm:$0xff] %v796_v50  ;;  %v1037_v41 = vadd.f32 %v1036_v49, %v1035_v62 }
 0x16e   : > { %v797_v23 = vsel %vm540_vm11, %v795_v22, %v783_v44  ;;  %v1052_v63 = vsel %vm540_vm11, %v1050_v17, %v1038_v20 }
 0x16f   : > { %799 = vst [vmem:[%s1871_s28 + $0x18] sm:$0xff] %v797_v23  ;;  %v1039_v56 = vmul.f32 %v1037_v41, %v1676_v14  ;;  %1054 = vst [vmem:[%s1871_s28 + $0x20] sm:$0xff] %v1052_v63 }
 0x171   : > { %v1053_v1 = vsel %vm540_vm11, %v1051_v13, %v1039_v56 }
 0x172   : > { %1055 = vst [vmem:[%s1871_s28 + $0x28] sm:$0xff] %v1053_v1 }
 0x173   : > { %1383 = shalt.err (!%p1380_p1)
}
 0x174   : > { %s1384_s27 = scalar_lea.hbm %s2142_s24, 1024  ;;  %s1388_s3 = scalar_lea.hbm %s2195_s2, 2048 }
 0x175   : > { %p1385_p11 = scmp.ne.s32.totalorder %s2142_s24, %s1384_s27  ;;  %p1389_p4 = scmp.lt.u32.totalorder %s2142_s24, %s2195_s2 }
 0x176   : > { %p1390_p10 = scmp.lt.u32.totalorder %s1388_s3, %s1384_s27  ;;  %p1392_p13 = scmp.lt.u32.totalorder %s1384_s27, %s2142_s24 }
 0x177   : > { %p1386_p12 = pnand %p1385_p11, %p2208_p3 }
 0x178   : > { %p1391_p6 = por %p1390_p10, %p1389_p4 }
 0x179   : > { %p1387_p2 = pneg %p1386_p12 }
 0x17a   : > { %p1393_p7 = por %p1392_p13, %p1391_p6 }
 0x17c   : > { %p1394_p5 = pnand %p1393_p7, %p1387_p2 }
 0x17e   : > { %1397 = shalt.err (!%p1394_p5)
}
 0x17f   : > { %s1465_s20 = smov 256   ;;  %s1466_s14 = smov 16  }
 0x180   : > { %1240 = dma.vmem_to_hbm [thread:$0]  (%p2208_p3), %s2144_s4, 1024, %s2142_s24, %s1106_s17, %s1465_s20, %s1465_s20, %s1466_s14  }
 0x181 PF: > { %s1134_s28 = sand.u32 1, %s1428_s9   ;;  %p2209_p8 = scmp.ne.s32.totalorder %s2201_s22, 0 }
 0x182   : > { %p2210_p9 = scmp.ge.s32.totalorder %s1440_s12, 2  ;;  %s1135_s30 = scalar_lea.sflag [#allocation5], %s1134_s28 }
 0x184   : > { %p1250_p0 = pnand %p2210_p9, %p2209_p8 }
 0x186   : > { %1423 = dma.done.wait (!%p1250_p0), %s1135_s30, 1024  }
 0x187   : > { %1425 = vsyncadd (!%p1250_p0), %s1135_s30, 4294966272  ;;  %p18_p1 = scmp.ge.s32.totalorder %s1507_s15, 4   ;;  %s2211_s9 = smov %s1432_s10 }
 0x188   : > { %s2212_s10 = smov %s1436_s11  ;;  %s2213_s11 = smov %s1519_s18 }
 0x189   : > { %s2214_s12 = smov %s1507_s15  ;;  %20 = sbr.rel (!%p18_p1) target bundleno = 7 (0x7), region = 86 }
 0x190   :  { %1140 = vsyncpa [#allocation4], 1 }
 0x191   :  { %1142 = vsyncpa [#allocation4 + $0x1], 1 }
 0x192   :  { %1143 = vsyncpa [#allocation7], 1 }
 0x193   :  { %1145 = vsyncpa [#allocation7 + $0x1], 1 }
 0x194   :  { %1146 = vsyncpa [#allocation5], 1 }
 0x195   :  { %1148 = vsyncpa [#allocation5 + $0x1], 1 }

</bundles_post_ra>
